<compile_context>
chip_gen: v5e
topology: v5e:2x2
jax: 0.10.0
libtpu: 0.0.40
codegen_flags: <defaults>
</compile_context>

<pallas_src>
import functools
import math

import jax
import jax.numpy as jnp
from jax.experimental import pallas as pl
from jax.experimental.pallas import tpu as pltpu

D_MODEL = 32
N_HEADS = 4
D_HEAD = D_MODEL // N_HEADS
D_FF = 64
N_LAYERS = 2
EPS = 1e-6
VEC_W = 3 * D_MODEL           # packed param-vector width (>= max(3*D, F, D))
ROWS_PER_LAYER = 8            # ln1_a, ln1_b, bqkv, bo, ln2_a, ln2_b, b1, b2


# ----------------------------------------------------------------------------
# Single fused encoder kernel (2 layers + final LN, everything VMEM-resident)
# ----------------------------------------------------------------------------
def encoder_kernel(x_ref, vecs_ref, wqkv_ref, wo_ref, w1_ref, w2_ref, o_ref,
                   *, n_layers, n_heads, batch, seq, eps):
    BS, D = x_ref.shape
    B, S, H = batch, seq, n_heads
    Dh = D // H
    BH = B * H
    F = w1_ref.shape[-1]

    vec = vecs_ref[...]                      # (8L+2, 3D): all small params, one load

    def row(r, w):
        return vec[r:r + 1, 0:w]             # (1, w) static slice, broadcasts over rows

    def layer_norm(x, a, b):
        # annotated-transformer LayerNorm: unbiased std, eps added to std.
        mean = jnp.mean(x, axis=-1, keepdims=True)
        xc = x - mean
        var = jnp.sum(xc * xc, axis=-1, keepdims=True) * (1.0 / (D - 1))
        inv = pl.reciprocal(jnp.sqrt(var) + eps, approx=True)    # EUP vrcp, per-row
        return a * (xc * inv) + b

    def split_heads(t3, col0):
        # t3: (B, S, 3D) fused qkv activations. Per-head lane slices stacked into a
        # leading head axis -> (B*H, S, Dh). Leading-dim reshapes only.
        parts = [t3[:, :, col0 + h * Dh: col0 + (h + 1) * Dh] for h in range(H)]
        return jnp.stack(parts, axis=1).reshape(BH, S, Dh)

    x = x_ref[...]                           # (B*S, D) resident value

    for l in range(n_layers):                # static unroll (tiny L)
        base = l * ROWS_PER_LAYER
        ln1_a, ln1_b = row(base + 0, D), row(base + 1, D)
        bqkv = row(base + 2, 3 * D)
        bo = row(base + 3, D)
        ln2_a, ln2_b = row(base + 4, D), row(base + 5, D)
        b1 = row(base + 6, F)
        b2 = row(base + 7, D)

        # --------------- self-attention sublayer: x = x + MHA(LN(x)) ---------------
        xn = layer_norm(x, ln1_a, ln1_b)                                   # (BS, D)
        # single fused QKV projection; 1/sqrt(d_k) pre-folded into q cols/bias
        qkv = jnp.dot(xn, wqkv_ref[l],
                      preferred_element_type=jnp.float32) + bqkv           # (BS, 3D)
        qkv3 = qkv.reshape(B, S, 3 * D)

        qh = split_heads(qkv3, 0)                                          # (BH, S, Dh)
        kh = split_heads(qkv3, D)
        vh = split_heads(qkv3, 2 * D)

        s = jnp.einsum('nqd,nkd->nqk', qh, kh,
                       preferred_element_type=jnp.float32)                 # (BH, S, S)
        s = s - jnp.max(s, axis=-1, keepdims=True)
        p = jnp.exp(s)
        p = p * pl.reciprocal(jnp.sum(p, axis=-1, keepdims=True), approx=True)
        ctx = jnp.einsum('nqk,nkd->nqd', p, vh,
                         preferred_element_type=jnp.float32)               # (BH, S, Dh)

        # merge heads back into lanes, then ONE output-projection matmul
        ctx4 = ctx.reshape(B, H, S, Dh)
        ctx_m = jnp.concatenate([ctx4[:, h] for h in range(H)], axis=-1)   # (B, S, D)
        ctx_m = ctx_m.reshape(BS, D)
        attn = jnp.dot(ctx_m, wo_ref[l],
                       preferred_element_type=jnp.float32) + bo
        x = x + attn                                                       # residual

        # --------------- feed-forward sublayer: x = x + FFN(LN(x)) -----------------
        xn = layer_norm(x, ln2_a, ln2_b)
        h1 = jnp.dot(xn, w1_ref[l], preferred_element_type=jnp.float32) + b1
        h1 = jnp.maximum(h1, 0.0)
        ff = jnp.dot(h1, w2_ref[l], preferred_element_type=jnp.float32) + b2
        x = x + ff                                                         # residual

    norm_a = row(n_layers * ROWS_PER_LAYER + 0, D)
    norm_b = row(n_layers * ROWS_PER_LAYER + 1, D)
    # TODO(synk): at real sizes make D a multiple of 128 (or write a lane-dense
    # slab) so this store is unmasked; at D=32 the masked vst is negligible.
    o_ref[...] = layer_norm(x, norm_a, norm_b)


# ----------------------------------------------------------------------------
# Parameter prep (plain JAX, runs once): fuse QKV, fold attention scale, and
# pack every small vector parameter into one (8L+2, 3D) array.
# ----------------------------------------------------------------------------
def prepare_params(params):
    scale = 1.0 / math.sqrt(D_HEAD)

    def pad_row(v):
        return jnp.pad(v, (0, VEC_W - v.shape[0]))

    vec_rows, wqkv_l, wo_l, w1_l, w2_l = [], [], [], [], []
    for lp in params['layers']:
        wqkv = jnp.concatenate([lp['wq'] * scale, lp['wk'], lp['wv']], axis=1)  # (D, 3D)
        bqkv = jnp.concatenate([lp['bq'] * scale, lp['bk'], lp['bv']])          # (3D,)
        wqkv_l.append(wqkv)
        wo_l.append(lp['wo'])
        w1_l.append(lp['w1'])
        w2_l.append(lp['w2'])
        vec_rows += [pad_row(lp['ln1_a']), pad_row(lp['ln1_b']), bqkv,
                     pad_row(lp['bo']), pad_row(lp['ln2_a']), pad_row(lp['ln2_b']),
                     pad_row(lp['b1']), pad_row(lp['b2'])]
    vec_rows += [pad_row(params['norm_a']), pad_row(params['norm_b'])]

    return (jnp.stack(vec_rows),   # (8L+2, 3D)  all small params
            jnp.stack(wqkv_l),     # (L, D, 3D)  fused QKV weights
            jnp.stack(wo_l),       # (L, D, D)
            jnp.stack(w1_l),       # (L, D, F)
            jnp.stack(w2_l))       # (L, F, D)


def _cost_estimate(B, S, D, H, F, L):
    BS, BH, Dh = B * S, B * H, D // H
    per_layer = (2 * BS * D * 3 * D            # fused QKV projection
                 + 2 * BH * S * S * Dh * 2     # scores + context
                 + 2 * BS * D * D              # output projection
                 + 2 * BS * D * F + 2 * BS * F * D)   # FFN
    flops = L * per_layer
    transcendentals = L * (BH * S * S + 3 * BS + BH * S) + 2 * BS
    bytes_accessed = 4 * (2 * BS * D
                          + (ROWS_PER_LAYER * L + 2) * 3 * D
                          + L * (D * 3 * D + D * D + D * F + F * D))
    return pl.CostEstimate(flops=flops, transcendentals=transcendentals,
                           bytes_accessed=bytes_accessed)


@jax.jit
def encoder_forward(x, vecs, wqkv, wo, w1, w2):
    B, S, D = x.shape
    kernel = functools.partial(encoder_kernel, n_layers=N_LAYERS, n_heads=N_HEADS,
                               batch=B, seq=S, eps=EPS)
    # Whole problem (~2 KiB activations + ~70 KiB weights) fits in VMEM: no grid,
    # 6 input DMAs total.
    # TODO(synk): at real sizes add a token grid with dimension_semantics=
    # ("parallel",) for v7x's 2 TensorCores, stream per-layer weights via an
    # "arbitrary" L grid axis (v7x VMEM = 64 MiB) with vmem_limit_bytes set, and
    # cast matmul operands to bf16 on v6e/v7x (keep f32 accumulation).
    out = pl.pallas_call(
        kernel,
        out_shape=jax.ShapeDtypeStruct((B * S, D), x.dtype),
        in_specs=[pl.BlockSpec(memory_space=pltpu.MemorySpace.VMEM)] * 6,
        out_specs=pl.BlockSpec(memory_space=pltpu.MemorySpace.VMEM),
        cost_estimate=_cost_estimate(B, S, D, N_HEADS, D_FF, N_LAYERS),
    )(x.reshape(B * S, D), vecs, wqkv, wo, w1, w2)
    return out.reshape(B, S, D)


# ----------------------------------------------------------------------------
# Pure-JAX reference (same math, unstacked params) for the correctness check
# ----------------------------------------------------------------------------
def ref_layernorm(x, a, b, eps=EPS):
    mean = x.mean(-1, keepdims=True)
    std = jnp.sqrt(((x - mean) ** 2).sum(-1, keepdims=True) / (x.shape[-1] - 1))
    return a * (x - mean) / (std + eps) + b


def ref_encoder(x, params):
    for lp in params['layers']:
        xn = ref_layernorm(x, lp['ln1_a'], lp['ln1_b'])
        q = xn @ lp['wq'] + lp['bq']
        k = xn @ lp['wk'] + lp['bk']
        v = xn @ lp['wv'] + lp['bv']
        B, S, D = q.shape
        qh = q.reshape(B, S, N_HEADS, D_HEAD).transpose(0, 2, 1, 3)
        kh = k.reshape(B, S, N_HEADS, D_HEAD).transpose(0, 2, 1, 3)
        vh = v.reshape(B, S, N_HEADS, D_HEAD).transpose(0, 2, 1, 3)
        s = jnp.einsum('bhqd,bhkd->bhqk', qh, kh) / math.sqrt(D_HEAD)
        p = jax.nn.softmax(s, axis=-1)
        ctx = jnp.einsum('bhqk,bhkd->bhqd', p, vh).transpose(0, 2, 1, 3).reshape(B, S, D)
        x = x + (ctx @ lp['wo'] + lp['bo'])
        xn = ref_layernorm(x, lp['ln2_a'], lp['ln2_b'])
        h = jnp.maximum(xn @ lp['w1'] + lp['b1'], 0.0)
        x = x + (h @ lp['w2'] + lp['b2'])
    return ref_layernorm(x, params['norm_a'], params['norm_b'])


# ----------------------------------------------------------------------------
# Deterministic parameter init
# ----------------------------------------------------------------------------
def init_params(key):
    def lin(k, din, dout):
        return jax.random.normal(k, (din, dout), jnp.float32) / math.sqrt(din)

    params = {'layers': []}
    for i in range(N_LAYERS):
        ks = jax.random.split(jax.random.fold_in(key, i), 6)
        params['layers'].append({
            'ln1_a': jnp.ones((D_MODEL,), jnp.float32),
            'ln1_b': jnp.zeros((D_MODEL,), jnp.float32),
            'wq': lin(ks[0], D_MODEL, D_MODEL), 'bq': jnp.zeros((D_MODEL,), jnp.float32),
            'wk': lin(ks[1], D_MODEL, D_MODEL), 'bk': jnp.zeros((D_MODEL,), jnp.float32),
            'wv': lin(ks[2], D_MODEL, D_MODEL), 'bv': jnp.zeros((D_MODEL,), jnp.float32),
            'wo': lin(ks[3], D_MODEL, D_MODEL), 'bo': jnp.zeros((D_MODEL,), jnp.float32),
            'ln2_a': jnp.ones((D_MODEL,), jnp.float32),
            'ln2_b': jnp.zeros((D_MODEL,), jnp.float32),
            'w1': lin(ks[4], D_MODEL, D_FF), 'b1': jnp.zeros((D_FF,), jnp.float32),
            'w2': lin(ks[5], D_FF, D_MODEL), 'b2': jnp.zeros((D_MODEL,), jnp.float32),
        })
    params['norm_a'] = jnp.ones((D_MODEL,), jnp.float32)
    params['norm_b'] = jnp.zeros((D_MODEL,), jnp.float32)
    return params


if __name__ == "__main__":
    key = jax.random.PRNGKey(0)
    k_x, k_p = jax.random.split(key)
    B, S = 2, 8
    x = jax.random.normal(k_x, (B, S, D_MODEL), jnp.float32)
    params = init_params(k_p)
    packed = prepare_params(params)

    out = jax.block_until_ready(encoder_forward(x, *packed))
    ref = jax.block_until_ready(ref_encoder(x, params))

    assert out.shape == (B, S, D_MODEL)
    assert jnp.allclose(out, ref, atol=1e-2, rtol=1e-2), "mismatch vs reference"
    # TODO(synk): dropout in SublayerConnection omitted (deterministic / eval mode).
    print("KERNEL_OK")
</pallas_src>

<mosaic_0001>
module attributes {stable_mosaic.version = 11 : i64} {
  func.func @encoder_kernel(%arg0: memref<16x32xf32, #tpu.memory_space<vmem>>, %arg1: memref<18x96xf32, #tpu.memory_space<vmem>>, %arg2: memref<2x32x96xf32, #tpu.memory_space<vmem>>, %arg3: memref<2x32x32xf32, #tpu.memory_space<vmem>>, %arg4: memref<2x32x64xf32, #tpu.memory_space<vmem>>, %arg5: memref<2x64x32xf32, #tpu.memory_space<vmem>>, %arg6: memref<16x32xf32, #tpu.memory_space<vmem>>) attributes {dimension_semantics = [], scalar_prefetch = 0 : i64, scratch_operands = 0 : i64, tpu.core_type = #tpu.core_type<tc>} {
    %c0 = arith.constant 0 : index
    %c0_0 = arith.constant 0 : index
    %0 = vector.load %arg1[%c0, %c0_0] : memref<18x96xf32, #tpu.memory_space<vmem>>, vector<18x96xf32>
    %c0_1 = arith.constant 0 : index
    %c0_2 = arith.constant 0 : index
    %1 = vector.load %arg0[%c0_1, %c0_2] : memref<16x32xf32, #tpu.memory_space<vmem>>, vector<16x32xf32>
    %2 = vector.extract_strided_slice %0 {offsets = [0, 0], sizes = [1, 32], strides = [1, 1]} : vector<18x96xf32> to vector<1x32xf32>
    %3 = vector.extract_strided_slice %0 {offsets = [1, 0], sizes = [1, 32], strides = [1, 1]} : vector<18x96xf32> to vector<1x32xf32>
    %4 = vector.extract_strided_slice %0 {offsets = [2, 0], sizes = [1, 96], strides = [1, 1]} : vector<18x96xf32> to vector<1x96xf32>
    %5 = vector.extract_strided_slice %0 {offsets = [3, 0], sizes = [1, 32], strides = [1, 1]} : vector<18x96xf32> to vector<1x32xf32>
    %6 = vector.extract_strided_slice %0 {offsets = [4, 0], sizes = [1, 32], strides = [1, 1]} : vector<18x96xf32> to vector<1x32xf32>
    %7 = vector.extract_strided_slice %0 {offsets = [5, 0], sizes = [1, 32], strides = [1, 1]} : vector<18x96xf32> to vector<1x32xf32>
    %8 = vector.extract_strided_slice %0 {offsets = [6, 0], sizes = [1, 64], strides = [1, 1]} : vector<18x96xf32> to vector<1x64xf32>
    %9 = vector.extract_strided_slice %0 {offsets = [7, 0], sizes = [1, 32], strides = [1, 1]} : vector<18x96xf32> to vector<1x32xf32>
    %cst = arith.constant dense<0.000000e+00> : vector<16xf32>
    %10 = vector.multi_reduction <add>, %1, %cst [1] : vector<16x32xf32> to vector<16xf32>
    %11 = vector.shape_cast %10 : vector<16xf32> to vector<16x1xf32>
    %cst_3 = arith.constant 3.200000e+01 : f32
    %12 = vector.broadcast %cst_3 : f32 to vector<16x1xf32>
    %13 = arith.divf %11, %12 : vector<16x1xf32>
    %14 = vector.broadcast %13 : vector<16x1xf32> to vector<16x32xf32>
    %15 = arith.subf %1, %14 : vector<16x32xf32>
    %16 = arith.mulf %15, %15 : vector<16x32xf32>
    %cst_4 = arith.constant dense<0.000000e+00> : vector<16xf32>
    %17 = vector.multi_reduction <add>, %16, %cst_4 [1] : vector<16x32xf32> to vector<16xf32>
    %18 = vector.shape_cast %17 : vector<16xf32> to vector<16x1xf32>
    %cst_5 = arith.constant 0.0322580636 : f32
    %19 = vector.broadcast %cst_5 : f32 to vector<16x1xf32>
    %20 = arith.mulf %18, %19 : vector<16x1xf32>
    %21 = math.sqrt %20 : vector<16x1xf32>
    %cst_6 = arith.constant 9.99999997E-7 : f32
    %22 = vector.broadcast %cst_6 : f32 to vector<16x1xf32>
    %23 = arith.addf %21, %22 : vector<16x1xf32>
    %24 = tpu.reciprocal %23 {approx = true} : vector<16x1xf32> -> vector<16x1xf32>
    %25 = vector.broadcast %24 : vector<16x1xf32> to vector<16x32xf32>
    %26 = arith.mulf %15, %25 : vector<16x32xf32>
    %27 = vector.broadcast %2 : vector<1x32xf32> to vector<16x32xf32>
    %28 = arith.mulf %27, %26 : vector<16x32xf32>
    %29 = vector.broadcast %3 : vector<1x32xf32> to vector<16x32xf32>
    %30 = arith.addf %28, %29 : vector<16x32xf32>
    %c0_7 = arith.constant 0 : index
    %c0_8 = arith.constant 0 : index
    %c0_9 = arith.constant 0 : index
    %31 = vector.load %arg2[%c0_7, %c0_8, %c0_9] : memref<2x32x96xf32, #tpu.memory_space<vmem>>, vector<1x32x96xf32>
    %32 = vector.shape_cast %31 : vector<1x32x96xf32> to vector<32x96xf32>
    %cst_10 = arith.constant dense<0.000000e+00> : vector<16x96xf32>
    %33 = tpu.matmul %30, %32, %cst_10 {dimension_numbers = #tpu.dot_dimension_numbers<[1], [0], [0], [1], [0, 0, 1, 1], [], []>} : vector<16x32xf32>, vector<32x96xf32>, vector<16x96xf32> -> vector<16x96xf32>
    %34 = vector.broadcast %4 : vector<1x96xf32> to vector<16x96xf32>
    %35 = arith.addf %33, %34 : vector<16x96xf32>
    %36 = vector.shape_cast %35 : vector<16x96xf32> to vector<2x8x96xf32>
    %37 = vector.extract_strided_slice %36 {offsets = [0, 0, 0], sizes = [2, 8, 8], strides = [1, 1, 1]} : vector<2x8x96xf32> to vector<2x8x8xf32>
    %38 = vector.extract_strided_slice %36 {offsets = [0, 0, 8], sizes = [2, 8, 8], strides = [1, 1, 1]} : vector<2x8x96xf32> to vector<2x8x8xf32>
    %39 = vector.extract_strided_slice %36 {offsets = [0, 0, 16], sizes = [2, 8, 8], strides = [1, 1, 1]} : vector<2x8x96xf32> to vector<2x8x8xf32>
    %40 = vector.extract_strided_slice %36 {offsets = [0, 0, 24], sizes = [2, 8, 8], strides = [1, 1, 1]} : vector<2x8x96xf32> to vector<2x8x8xf32>
    %41 = vector.shape_cast %37 : vector<2x8x8xf32> to vector<2x1x8x8xf32>
    %42 = vector.shape_cast %38 : vector<2x8x8xf32> to vector<2x1x8x8xf32>
    %43 = vector.shape_cast %39 : vector<2x8x8xf32> to vector<2x1x8x8xf32>
    %44 = vector.shape_cast %40 : vector<2x8x8xf32> to vector<2x1x8x8xf32>
    %45 = tpu.concatenate %41, %42, %43, %44 in 1 : vector<2x1x8x8xf32>, vector<2x1x8x8xf32>, vector<2x1x8x8xf32>, vector<2x1x8x8xf32> -> vector<2x4x8x8xf32>
    %46 = vector.shape_cast %45 : vector<2x4x8x8xf32> to vector<8x8x8xf32>
    %47 = vector.extract_strided_slice %36 {offsets = [0, 0, 32], sizes = [2, 8, 8], strides = [1, 1, 1]} : vector<2x8x96xf32> to vector<2x8x8xf32>
    %48 = vector.extract_strided_slice %36 {offsets = [0, 0, 40], sizes = [2, 8, 8], strides = [1, 1, 1]} : vector<2x8x96xf32> to vector<2x8x8xf32>
    %49 = vector.extract_strided_slice %36 {offsets = [0, 0, 48], sizes = [2, 8, 8], strides = [1, 1, 1]} : vector<2x8x96xf32> to vector<2x8x8xf32>
    %50 = vector.extract_strided_slice %36 {offsets = [0, 0, 56], sizes = [2, 8, 8], strides = [1, 1, 1]} : vector<2x8x96xf32> to vector<2x8x8xf32>
    %51 = vector.shape_cast %47 : vector<2x8x8xf32> to vector<2x1x8x8xf32>
    %52 = vector.shape_cast %48 : vector<2x8x8xf32> to vector<2x1x8x8xf32>
    %53 = vector.shape_cast %49 : vector<2x8x8xf32> to vector<2x1x8x8xf32>
    %54 = vector.shape_cast %50 : vector<2x8x8xf32> to vector<2x1x8x8xf32>
    %55 = tpu.concatenate %51, %52, %53, %54 in 1 : vector<2x1x8x8xf32>, vector<2x1x8x8xf32>, vector<2x1x8x8xf32>, vector<2x1x8x8xf32> -> vector<2x4x8x8xf32>
    %56 = vector.shape_cast %55 : vector<2x4x8x8xf32> to vector<8x8x8xf32>
    %57 = vector.extract_strided_slice %36 {offsets = [0, 0, 64], sizes = [2, 8, 8], strides = [1, 1, 1]} : vector<2x8x96xf32> to vector<2x8x8xf32>
    %58 = vector.extract_strided_slice %36 {offsets = [0, 0, 72], sizes = [2, 8, 8], strides = [1, 1, 1]} : vector<2x8x96xf32> to vector<2x8x8xf32>
    %59 = vector.extract_strided_slice %36 {offsets = [0, 0, 80], sizes = [2, 8, 8], strides = [1, 1, 1]} : vector<2x8x96xf32> to vector<2x8x8xf32>
    %60 = vector.extract_strided_slice %36 {offsets = [0, 0, 88], sizes = [2, 8, 8], strides = [1, 1, 1]} : vector<2x8x96xf32> to vector<2x8x8xf32>
    %61 = vector.shape_cast %57 : vector<2x8x8xf32> to vector<2x1x8x8xf32>
    %62 = vector.shape_cast %58 : vector<2x8x8xf32> to vector<2x1x8x8xf32>
    %63 = vector.shape_cast %59 : vector<2x8x8xf32> to vector<2x1x8x8xf32>
    %64 = vector.shape_cast %60 : vector<2x8x8xf32> to vector<2x1x8x8xf32>
    %65 = tpu.concatenate %61, %62, %63, %64 in 1 : vector<2x1x8x8xf32>, vector<2x1x8x8xf32>, vector<2x1x8x8xf32>, vector<2x1x8x8xf32> -> vector<2x4x8x8xf32>
    %66 = vector.shape_cast %65 : vector<2x4x8x8xf32> to vector<8x8x8xf32>
    "tpu.trace_start"() <{level = 10 : i32, message = "nqd,nkd->nqk"}> : () -> ()
    %cst_11 = arith.constant dense<0.000000e+00> : vector<8x8x8xf32>
    %67 = tpu.matmul %46, %56, %cst_11 {dimension_numbers = #tpu.dot_dimension_numbers<[2], [2], [1], [1], [0, 0, 0, 1, 1, 1], [0], [0]>} : vector<8x8x8xf32>, vector<8x8x8xf32>, vector<8x8x8xf32> -> vector<8x8x8xf32>
    "tpu.trace_stop"() : () -> ()
    %cst_12 = arith.constant dense<0xFF800000> : vector<8x8xf32>
    %68 = vector.multi_reduction <maximumf>, %67, %cst_12 [2] : vector<8x8x8xf32> to vector<8x8xf32>
    %69 = vector.shape_cast %68 : vector<8x8xf32> to vector<8x8x1xf32>
    %70 = vector.broadcast %69 : vector<8x8x1xf32> to vector<8x8x8xf32>
    %71 = arith.subf %67, %70 : vector<8x8x8xf32>
    %72 = math.exp %71 : vector<8x8x8xf32>
    %cst_13 = arith.constant dense<0.000000e+00> : vector<8x8xf32>
    %73 = vector.multi_reduction <add>, %72, %cst_13 [2] : vector<8x8x8xf32> to vector<8x8xf32>
    %74 = vector.shape_cast %73 : vector<8x8xf32> to vector<8x8x1xf32>
    %75 = tpu.reciprocal %74 {approx = true} : vector<8x8x1xf32> -> vector<8x8x1xf32>
    %76 = vector.broadcast %75 : vector<8x8x1xf32> to vector<8x8x8xf32>
    %77 = arith.mulf %72, %76 : vector<8x8x8xf32>
    "tpu.trace_start"() <{level = 10 : i32, message = "nqk,nkd->nqd"}> : () -> ()
    %cst_14 = arith.constant dense<0.000000e+00> : vector<8x8x8xf32>
    %78 = tpu.matmul %77, %66, %cst_14 {dimension_numbers = #tpu.dot_dimension_numbers<[2], [1], [1], [2], [0, 0, 0, 1, 1, 2], [0], [0]>} : vector<8x8x8xf32>, vector<8x8x8xf32>, vector<8x8x8xf32> -> vector<8x8x8xf32>
    "tpu.trace_stop"() : () -> ()
    %79 = vector.shape_cast %78 : vector<8x8x8xf32> to vector<2x4x8x8xf32>
    %80 = vector.extract_strided_slice %79 {offsets = [0, 0, 0, 0], sizes = [2, 1, 8, 8], strides = [1, 1, 1, 1]} : vector<2x4x8x8xf32> to vector<2x1x8x8xf32>
    %81 = vector.shape_cast %80 : vector<2x1x8x8xf32> to vector<2x8x8xf32>
    %82 = vector.extract_strided_slice %79 {offsets = [0, 1, 0, 0], sizes = [2, 1, 8, 8], strides = [1, 1, 1, 1]} : vector<2x4x8x8xf32> to vector<2x1x8x8xf32>
    %83 = vector.shape_cast %82 : vector<2x1x8x8xf32> to vector<2x8x8xf32>
    %84 = vector.extract_strided_slice %79 {offsets = [0, 2, 0, 0], sizes = [2, 1, 8, 8], strides = [1, 1, 1, 1]} : vector<2x4x8x8xf32> to vector<2x1x8x8xf32>
    %85 = vector.shape_cast %84 : vector<2x1x8x8xf32> to vector<2x8x8xf32>
    %86 = vector.extract_strided_slice %79 {offsets = [0, 3, 0, 0], sizes = [2, 1, 8, 8], strides = [1, 1, 1, 1]} : vector<2x4x8x8xf32> to vector<2x1x8x8xf32>
    %87 = vector.shape_cast %86 : vector<2x1x8x8xf32> to vector<2x8x8xf32>
    %88 = tpu.concatenate %81, %83, %85, %87 in 2 : vector<2x8x8xf32>, vector<2x8x8xf32>, vector<2x8x8xf32>, vector<2x8x8xf32> -> vector<2x8x32xf32>
    %89 = vector.shape_cast %88 : vector<2x8x32xf32> to vector<16x32xf32>
    %c0_15 = arith.constant 0 : index
    %c0_16 = arith.constant 0 : index
    %c0_17 = arith.constant 0 : index
    %90 = vector.load %arg3[%c0_15, %c0_16, %c0_17] : memref<2x32x32xf32, #tpu.memory_space<vmem>>, vector<1x32x32xf32>
    %91 = vector.shape_cast %90 : vector<1x32x32xf32> to vector<32x32xf32>
    %cst_18 = arith.constant dense<0.000000e+00> : vector<16x32xf32>
    %92 = tpu.matmul %89, %91, %cst_18 {dimension_numbers = #tpu.dot_dimension_numbers<[1], [0], [0], [1], [0, 0, 1, 1], [], []>} : vector<16x32xf32>, vector<32x32xf32>, vector<16x32xf32> -> vector<16x32xf32>
    %93 = vector.broadcast %5 : vector<1x32xf32> to vector<16x32xf32>
    %94 = arith.addf %92, %93 : vector<16x32xf32>
    %95 = arith.addf %1, %94 : vector<16x32xf32>
    %cst_19 = arith.constant dense<0.000000e+00> : vector<16xf32>
    %96 = vector.multi_reduction <add>, %95, %cst_19 [1] : vector<16x32xf32> to vector<16xf32>
    %97 = vector.shape_cast %96 : vector<16xf32> to vector<16x1xf32>
    %cst_20 = arith.constant 3.200000e+01 : f32
    %98 = vector.broadcast %cst_20 : f32 to vector<16x1xf32>
    %99 = arith.divf %97, %98 : vector<16x1xf32>
    %100 = vector.broadcast %99 : vector<16x1xf32> to vector<16x32xf32>
    %101 = arith.subf %95, %100 : vector<16x32xf32>
    %102 = arith.mulf %101, %101 : vector<16x32xf32>
    %cst_21 = arith.constant dense<0.000000e+00> : vector<16xf32>
    %103 = vector.multi_reduction <add>, %102, %cst_21 [1] : vector<16x32xf32> to vector<16xf32>
    %104 = vector.shape_cast %103 : vector<16xf32> to vector<16x1xf32>
    %cst_22 = arith.constant 0.0322580636 : f32
    %105 = vector.broadcast %cst_22 : f32 to vector<16x1xf32>
    %106 = arith.mulf %104, %105 : vector<16x1xf32>
    %107 = math.sqrt %106 : vector<16x1xf32>
    %cst_23 = arith.constant 9.99999997E-7 : f32
    %108 = vector.broadcast %cst_23 : f32 to vector<16x1xf32>
    %109 = arith.addf %107, %108 : vector<16x1xf32>
    %110 = tpu.reciprocal %109 {approx = true} : vector<16x1xf32> -> vector<16x1xf32>
    %111 = vector.broadcast %110 : vector<16x1xf32> to vector<16x32xf32>
    %112 = arith.mulf %101, %111 : vector<16x32xf32>
    %113 = vector.broadcast %6 : vector<1x32xf32> to vector<16x32xf32>
    %114 = arith.mulf %113, %112 : vector<16x32xf32>
    %115 = vector.broadcast %7 : vector<1x32xf32> to vector<16x32xf32>
    %116 = arith.addf %114, %115 : vector<16x32xf32>
    %c0_24 = arith.constant 0 : index
    %c0_25 = arith.constant 0 : index
    %c0_26 = arith.constant 0 : index
    %117 = vector.load %arg4[%c0_24, %c0_25, %c0_26] : memref<2x32x64xf32, #tpu.memory_space<vmem>>, vector<1x32x64xf32>
    %118 = vector.shape_cast %117 : vector<1x32x64xf32> to vector<32x64xf32>
    %cst_27 = arith.constant dense<0.000000e+00> : vector<16x64xf32>
    %119 = tpu.matmul %116, %118, %cst_27 {dimension_numbers = #tpu.dot_dimension_numbers<[1], [0], [0], [1], [0, 0, 1, 1], [], []>} : vector<16x32xf32>, vector<32x64xf32>, vector<16x64xf32> -> vector<16x64xf32>
    %120 = vector.broadcast %8 : vector<1x64xf32> to vector<16x64xf32>
    %121 = arith.addf %119, %120 : vector<16x64xf32>
    %cst_28 = arith.constant 0.000000e+00 : f32
    %122 = vector.broadcast %cst_28 : f32 to vector<16x64xf32>
    %123 = arith.maximumf %121, %122 : vector<16x64xf32>
    %c0_29 = arith.constant 0 : index
    %c0_30 = arith.constant 0 : index
    %c0_31 = arith.constant 0 : index
    %124 = vector.load %arg5[%c0_29, %c0_30, %c0_31] : memref<2x64x32xf32, #tpu.memory_space<vmem>>, vector<1x64x32xf32>
    %125 = vector.shape_cast %124 : vector<1x64x32xf32> to vector<64x32xf32>
    %cst_32 = arith.constant dense<0.000000e+00> : vector<16x32xf32>
    %126 = tpu.matmul %123, %125, %cst_32 {dimension_numbers = #tpu.dot_dimension_numbers<[1], [0], [0], [1], [0, 0, 1, 1], [], []>} : vector<16x64xf32>, vector<64x32xf32>, vector<16x32xf32> -> vector<16x32xf32>
    %127 = vector.broadcast %9 : vector<1x32xf32> to vector<16x32xf32>
    %128 = arith.addf %126, %127 : vector<16x32xf32>
    %129 = arith.addf %95, %128 : vector<16x32xf32>
    %130 = vector.extract_strided_slice %0 {offsets = [8, 0], sizes = [1, 32], strides = [1, 1]} : vector<18x96xf32> to vector<1x32xf32>
    %131 = vector.extract_strided_slice %0 {offsets = [9, 0], sizes = [1, 32], strides = [1, 1]} : vector<18x96xf32> to vector<1x32xf32>
    %132 = vector.extract_strided_slice %0 {offsets = [10, 0], sizes = [1, 96], strides = [1, 1]} : vector<18x96xf32> to vector<1x96xf32>
    %133 = vector.extract_strided_slice %0 {offsets = [11, 0], sizes = [1, 32], strides = [1, 1]} : vector<18x96xf32> to vector<1x32xf32>
    %134 = vector.extract_strided_slice %0 {offsets = [12, 0], sizes = [1, 32], strides = [1, 1]} : vector<18x96xf32> to vector<1x32xf32>
    %135 = vector.extract_strided_slice %0 {offsets = [13, 0], sizes = [1, 32], strides = [1, 1]} : vector<18x96xf32> to vector<1x32xf32>
    %136 = vector.extract_strided_slice %0 {offsets = [14, 0], sizes = [1, 64], strides = [1, 1]} : vector<18x96xf32> to vector<1x64xf32>
    %137 = vector.extract_strided_slice %0 {offsets = [15, 0], sizes = [1, 32], strides = [1, 1]} : vector<18x96xf32> to vector<1x32xf32>
    %cst_33 = arith.constant dense<0.000000e+00> : vector<16xf32>
    %138 = vector.multi_reduction <add>, %129, %cst_33 [1] : vector<16x32xf32> to vector<16xf32>
    %139 = vector.shape_cast %138 : vector<16xf32> to vector<16x1xf32>
    %cst_34 = arith.constant 3.200000e+01 : f32
    %140 = vector.broadcast %cst_34 : f32 to vector<16x1xf32>
    %141 = arith.divf %139, %140 : vector<16x1xf32>
    %142 = vector.broadcast %141 : vector<16x1xf32> to vector<16x32xf32>
    %143 = arith.subf %129, %142 : vector<16x32xf32>
    %144 = arith.mulf %143, %143 : vector<16x32xf32>
    %cst_35 = arith.constant dense<0.000000e+00> : vector<16xf32>
    %145 = vector.multi_reduction <add>, %144, %cst_35 [1] : vector<16x32xf32> to vector<16xf32>
    %146 = vector.shape_cast %145 : vector<16xf32> to vector<16x1xf32>
    %cst_36 = arith.constant 0.0322580636 : f32
    %147 = vector.broadcast %cst_36 : f32 to vector<16x1xf32>
    %148 = arith.mulf %146, %147 : vector<16x1xf32>
    %149 = math.sqrt %148 : vector<16x1xf32>
    %cst_37 = arith.constant 9.99999997E-7 : f32
    %150 = vector.broadcast %cst_37 : f32 to vector<16x1xf32>
    %151 = arith.addf %149, %150 : vector<16x1xf32>
    %152 = tpu.reciprocal %151 {approx = true} : vector<16x1xf32> -> vector<16x1xf32>
    %153 = vector.broadcast %152 : vector<16x1xf32> to vector<16x32xf32>
    %154 = arith.mulf %143, %153 : vector<16x32xf32>
    %155 = vector.broadcast %130 : vector<1x32xf32> to vector<16x32xf32>
    %156 = arith.mulf %155, %154 : vector<16x32xf32>
    %157 = vector.broadcast %131 : vector<1x32xf32> to vector<16x32xf32>
    %158 = arith.addf %156, %157 : vector<16x32xf32>
    %c1 = arith.constant 1 : index
    %c0_38 = arith.constant 0 : index
    %c0_39 = arith.constant 0 : index
    %159 = vector.load %arg2[%c1, %c0_38, %c0_39] : memref<2x32x96xf32, #tpu.memory_space<vmem>>, vector<1x32x96xf32>
    %160 = vector.shape_cast %159 : vector<1x32x96xf32> to vector<32x96xf32>
    %cst_40 = arith.constant dense<0.000000e+00> : vector<16x96xf32>
    %161 = tpu.matmul %158, %160, %cst_40 {dimension_numbers = #tpu.dot_dimension_numbers<[1], [0], [0], [1], [0, 0, 1, 1], [], []>} : vector<16x32xf32>, vector<32x96xf32>, vector<16x96xf32> -> vector<16x96xf32>
    %162 = vector.broadcast %132 : vector<1x96xf32> to vector<16x96xf32>
    %163 = arith.addf %161, %162 : vector<16x96xf32>
    %164 = vector.shape_cast %163 : vector<16x96xf32> to vector<2x8x96xf32>
    %165 = vector.extract_strided_slice %164 {offsets = [0, 0, 0], sizes = [2, 8, 8], strides = [1, 1, 1]} : vector<2x8x96xf32> to vector<2x8x8xf32>
    %166 = vector.extract_strided_slice %164 {offsets = [0, 0, 8], sizes = [2, 8, 8], strides = [1, 1, 1]} : vector<2x8x96xf32> to vector<2x8x8xf32>
    %167 = vector.extract_strided_slice %164 {offsets = [0, 0, 16], sizes = [2, 8, 8], strides = [1, 1, 1]} : vector<2x8x96xf32> to vector<2x8x8xf32>
    %168 = vector.extract_strided_slice %164 {offsets = [0, 0, 24], sizes = [2, 8, 8], strides = [1, 1, 1]} : vector<2x8x96xf32> to vector<2x8x8xf32>
    %169 = vector.shape_cast %165 : vector<2x8x8xf32> to vector<2x1x8x8xf32>
    %170 = vector.shape_cast %166 : vector<2x8x8xf32> to vector<2x1x8x8xf32>
    %171 = vector.shape_cast %167 : vector<2x8x8xf32> to vector<2x1x8x8xf32>
    %172 = vector.shape_cast %168 : vector<2x8x8xf32> to vector<2x1x8x8xf32>
    %173 = tpu.concatenate %169, %170, %171, %172 in 1 : vector<2x1x8x8xf32>, vector<2x1x8x8xf32>, vector<2x1x8x8xf32>, vector<2x1x8x8xf32> -> vector<2x4x8x8xf32>
    %174 = vector.shape_cast %173 : vector<2x4x8x8xf32> to vector<8x8x8xf32>
    %175 = vector.extract_strided_slice %164 {offsets = [0, 0, 32], sizes = [2, 8, 8], strides = [1, 1, 1]} : vector<2x8x96xf32> to vector<2x8x8xf32>
    %176 = vector.extract_strided_slice %164 {offsets = [0, 0, 40], sizes = [2, 8, 8], strides = [1, 1, 1]} : vector<2x8x96xf32> to vector<2x8x8xf32>
    %177 = vector.extract_strided_slice %164 {offsets = [0, 0, 48], sizes = [2, 8, 8], strides = [1, 1, 1]} : vector<2x8x96xf32> to vector<2x8x8xf32>
    %178 = vector.extract_strided_slice %164 {offsets = [0, 0, 56], sizes = [2, 8, 8], strides = [1, 1, 1]} : vector<2x8x96xf32> to vector<2x8x8xf32>
    %179 = vector.shape_cast %175 : vector<2x8x8xf32> to vector<2x1x8x8xf32>
    %180 = vector.shape_cast %176 : vector<2x8x8xf32> to vector<2x1x8x8xf32>
    %181 = vector.shape_cast %177 : vector<2x8x8xf32> to vector<2x1x8x8xf32>
    %182 = vector.shape_cast %178 : vector<2x8x8xf32> to vector<2x1x8x8xf32>
    %183 = tpu.concatenate %179, %180, %181, %182 in 1 : vector<2x1x8x8xf32>, vector<2x1x8x8xf32>, vector<2x1x8x8xf32>, vector<2x1x8x8xf32> -> vector<2x4x8x8xf32>
    %184 = vector.shape_cast %183 : vector<2x4x8x8xf32> to vector<8x8x8xf32>
    %185 = vector.extract_strided_slice %164 {offsets = [0, 0, 64], sizes = [2, 8, 8], strides = [1, 1, 1]} : vector<2x8x96xf32> to vector<2x8x8xf32>
    %186 = vector.extract_strided_slice %164 {offsets = [0, 0, 72], sizes = [2, 8, 8], strides = [1, 1, 1]} : vector<2x8x96xf32> to vector<2x8x8xf32>
    %187 = vector.extract_strided_slice %164 {offsets = [0, 0, 80], sizes = [2, 8, 8], strides = [1, 1, 1]} : vector<2x8x96xf32> to vector<2x8x8xf32>
    %188 = vector.extract_strided_slice %164 {offsets = [0, 0, 88], sizes = [2, 8, 8], strides = [1, 1, 1]} : vector<2x8x96xf32> to vector<2x8x8xf32>
    %189 = vector.shape_cast %185 : vector<2x8x8xf32> to vector<2x1x8x8xf32>
    %190 = vector.shape_cast %186 : vector<2x8x8xf32> to vector<2x1x8x8xf32>
    %191 = vector.shape_cast %187 : vector<2x8x8xf32> to vector<2x1x8x8xf32>
    %192 = vector.shape_cast %188 : vector<2x8x8xf32> to vector<2x1x8x8xf32>
    %193 = tpu.concatenate %189, %190, %191, %192 in 1 : vector<2x1x8x8xf32>, vector<2x1x8x8xf32>, vector<2x1x8x8xf32>, vector<2x1x8x8xf32> -> vector<2x4x8x8xf32>
    %194 = vector.shape_cast %193 : vector<2x4x8x8xf32> to vector<8x8x8xf32>
    "tpu.trace_start"() <{level = 10 : i32, message = "nqd,nkd->nqk"}> : () -> ()
    %cst_41 = arith.constant dense<0.000000e+00> : vector<8x8x8xf32>
    %195 = tpu.matmul %174, %184, %cst_41 {dimension_numbers = #tpu.dot_dimension_numbers<[2], [2], [1], [1], [0, 0, 0, 1, 1, 1], [0], [0]>} : vector<8x8x8xf32>, vector<8x8x8xf32>, vector<8x8x8xf32> -> vector<8x8x8xf32>
    "tpu.trace_stop"() : () -> ()
    %cst_42 = arith.constant dense<0xFF800000> : vector<8x8xf32>
    %196 = vector.multi_reduction <maximumf>, %195, %cst_42 [2] : vector<8x8x8xf32> to vector<8x8xf32>
    %197 = vector.shape_cast %196 : vector<8x8xf32> to vector<8x8x1xf32>
    %198 = vector.broadcast %197 : vector<8x8x1xf32> to vector<8x8x8xf32>
    %199 = arith.subf %195, %198 : vector<8x8x8xf32>
    %200 = math.exp %199 : vector<8x8x8xf32>
    %cst_43 = arith.constant dense<0.000000e+00> : vector<8x8xf32>
    %201 = vector.multi_reduction <add>, %200, %cst_43 [2] : vector<8x8x8xf32> to vector<8x8xf32>
    %202 = vector.shape_cast %201 : vector<8x8xf32> to vector<8x8x1xf32>
    %203 = tpu.reciprocal %202 {approx = true} : vector<8x8x1xf32> -> vector<8x8x1xf32>
    %204 = vector.broadcast %203 : vector<8x8x1xf32> to vector<8x8x8xf32>
    %205 = arith.mulf %200, %204 : vector<8x8x8xf32>
    "tpu.trace_start"() <{level = 10 : i32, message = "nqk,nkd->nqd"}> : () -> ()
    %cst_44 = arith.constant dense<0.000000e+00> : vector<8x8x8xf32>
    %206 = tpu.matmul %205, %194, %cst_44 {dimension_numbers = #tpu.dot_dimension_numbers<[2], [1], [1], [2], [0, 0, 0, 1, 1, 2], [0], [0]>} : vector<8x8x8xf32>, vector<8x8x8xf32>, vector<8x8x8xf32> -> vector<8x8x8xf32>
    "tpu.trace_stop"() : () -> ()
    %207 = vector.shape_cast %206 : vector<8x8x8xf32> to vector<2x4x8x8xf32>
    %208 = vector.extract_strided_slice %207 {offsets = [0, 0, 0, 0], sizes = [2, 1, 8, 8], strides = [1, 1, 1, 1]} : vector<2x4x8x8xf32> to vector<2x1x8x8xf32>
    %209 = vector.shape_cast %208 : vector<2x1x8x8xf32> to vector<2x8x8xf32>
    %210 = vector.extract_strided_slice %207 {offsets = [0, 1, 0, 0], sizes = [2, 1, 8, 8], strides = [1, 1, 1, 1]} : vector<2x4x8x8xf32> to vector<2x1x8x8xf32>
    %211 = vector.shape_cast %210 : vector<2x1x8x8xf32> to vector<2x8x8xf32>
    %212 = vector.extract_strided_slice %207 {offsets = [0, 2, 0, 0], sizes = [2, 1, 8, 8], strides = [1, 1, 1, 1]} : vector<2x4x8x8xf32> to vector<2x1x8x8xf32>
    %213 = vector.shape_cast %212 : vector<2x1x8x8xf32> to vector<2x8x8xf32>
    %214 = vector.extract_strided_slice %207 {offsets = [0, 3, 0, 0], sizes = [2, 1, 8, 8], strides = [1, 1, 1, 1]} : vector<2x4x8x8xf32> to vector<2x1x8x8xf32>
    %215 = vector.shape_cast %214 : vector<2x1x8x8xf32> to vector<2x8x8xf32>
    %216 = tpu.concatenate %209, %211, %213, %215 in 2 : vector<2x8x8xf32>, vector<2x8x8xf32>, vector<2x8x8xf32>, vector<2x8x8xf32> -> vector<2x8x32xf32>
    %217 = vector.shape_cast %216 : vector<2x8x32xf32> to vector<16x32xf32>
    %c1_45 = arith.constant 1 : index
    %c0_46 = arith.constant 0 : index
    %c0_47 = arith.constant 0 : index
    %218 = vector.load %arg3[%c1_45, %c0_46, %c0_47] : memref<2x32x32xf32, #tpu.memory_space<vmem>>, vector<1x32x32xf32>
    %219 = vector.shape_cast %218 : vector<1x32x32xf32> to vector<32x32xf32>
    %cst_48 = arith.constant dense<0.000000e+00> : vector<16x32xf32>
    %220 = tpu.matmul %217, %219, %cst_48 {dimension_numbers = #tpu.dot_dimension_numbers<[1], [0], [0], [1], [0, 0, 1, 1], [], []>} : vector<16x32xf32>, vector<32x32xf32>, vector<16x32xf32> -> vector<16x32xf32>
    %221 = vector.broadcast %133 : vector<1x32xf32> to vector<16x32xf32>
    %222 = arith.addf %220, %221 : vector<16x32xf32>
    %223 = arith.addf %129, %222 : vector<16x32xf32>
    %cst_49 = arith.constant dense<0.000000e+00> : vector<16xf32>
    %224 = vector.multi_reduction <add>, %223, %cst_49 [1] : vector<16x32xf32> to vector<16xf32>
    %225 = vector.shape_cast %224 : vector<16xf32> to vector<16x1xf32>
    %cst_50 = arith.constant 3.200000e+01 : f32
    %226 = vector.broadcast %cst_50 : f32 to vector<16x1xf32>
    %227 = arith.divf %225, %226 : vector<16x1xf32>
    %228 = vector.broadcast %227 : vector<16x1xf32> to vector<16x32xf32>
    %229 = arith.subf %223, %228 : vector<16x32xf32>
    %230 = arith.mulf %229, %229 : vector<16x32xf32>
    %cst_51 = arith.constant dense<0.000000e+00> : vector<16xf32>
    %231 = vector.multi_reduction <add>, %230, %cst_51 [1] : vector<16x32xf32> to vector<16xf32>
    %232 = vector.shape_cast %231 : vector<16xf32> to vector<16x1xf32>
    %cst_52 = arith.constant 0.0322580636 : f32
    %233 = vector.broadcast %cst_52 : f32 to vector<16x1xf32>
    %234 = arith.mulf %232, %233 : vector<16x1xf32>
    %235 = math.sqrt %234 : vector<16x1xf32>
    %cst_53 = arith.constant 9.99999997E-7 : f32
    %236 = vector.broadcast %cst_53 : f32 to vector<16x1xf32>
    %237 = arith.addf %235, %236 : vector<16x1xf32>
    %238 = tpu.reciprocal %237 {approx = true} : vector<16x1xf32> -> vector<16x1xf32>
    %239 = vector.broadcast %238 : vector<16x1xf32> to vector<16x32xf32>
    %240 = arith.mulf %229, %239 : vector<16x32xf32>
    %241 = vector.broadcast %134 : vector<1x32xf32> to vector<16x32xf32>
    %242 = arith.mulf %241, %240 : vector<16x32xf32>
    %243 = vector.broadcast %135 : vector<1x32xf32> to vector<16x32xf32>
    %244 = arith.addf %242, %243 : vector<16x32xf32>
    %c1_54 = arith.constant 1 : index
    %c0_55 = arith.constant 0 : index
    %c0_56 = arith.constant 0 : index
    %245 = vector.load %arg4[%c1_54, %c0_55, %c0_56] : memref<2x32x64xf32, #tpu.memory_space<vmem>>, vector<1x32x64xf32>
    %246 = vector.shape_cast %245 : vector<1x32x64xf32> to vector<32x64xf32>
    %cst_57 = arith.constant dense<0.000000e+00> : vector<16x64xf32>
    %247 = tpu.matmul %244, %246, %cst_57 {dimension_numbers = #tpu.dot_dimension_numbers<[1], [0], [0], [1], [0, 0, 1, 1], [], []>} : vector<16x32xf32>, vector<32x64xf32>, vector<16x64xf32> -> vector<16x64xf32>
    %248 = vector.broadcast %136 : vector<1x64xf32> to vector<16x64xf32>
    %249 = arith.addf %247, %248 : vector<16x64xf32>
    %cst_58 = arith.constant 0.000000e+00 : f32
    %250 = vector.broadcast %cst_58 : f32 to vector<16x64xf32>
    %251 = arith.maximumf %249, %250 : vector<16x64xf32>
    %c1_59 = arith.constant 1 : index
    %c0_60 = arith.constant 0 : index
    %c0_61 = arith.constant 0 : index
    %252 = vector.load %arg5[%c1_59, %c0_60, %c0_61] : memref<2x64x32xf32, #tpu.memory_space<vmem>>, vector<1x64x32xf32>
    %253 = vector.shape_cast %252 : vector<1x64x32xf32> to vector<64x32xf32>
    %cst_62 = arith.constant dense<0.000000e+00> : vector<16x32xf32>
    %254 = tpu.matmul %251, %253, %cst_62 {dimension_numbers = #tpu.dot_dimension_numbers<[1], [0], [0], [1], [0, 0, 1, 1], [], []>} : vector<16x64xf32>, vector<64x32xf32>, vector<16x32xf32> -> vector<16x32xf32>
    %255 = vector.broadcast %137 : vector<1x32xf32> to vector<16x32xf32>
    %256 = arith.addf %254, %255 : vector<16x32xf32>
    %257 = arith.addf %223, %256 : vector<16x32xf32>
    %258 = vector.extract_strided_slice %0 {offsets = [16, 0], sizes = [1, 32], strides = [1, 1]} : vector<18x96xf32> to vector<1x32xf32>
    %259 = vector.extract_strided_slice %0 {offsets = [17, 0], sizes = [1, 32], strides = [1, 1]} : vector<18x96xf32> to vector<1x32xf32>
    %cst_63 = arith.constant dense<0.000000e+00> : vector<16xf32>
    %260 = vector.multi_reduction <add>, %257, %cst_63 [1] : vector<16x32xf32> to vector<16xf32>
    %261 = vector.shape_cast %260 : vector<16xf32> to vector<16x1xf32>
    %cst_64 = arith.constant 3.200000e+01 : f32
    %262 = vector.broadcast %cst_64 : f32 to vector<16x1xf32>
    %263 = arith.divf %261, %262 : vector<16x1xf32>
    %264 = vector.broadcast %263 : vector<16x1xf32> to vector<16x32xf32>
    %265 = arith.subf %257, %264 : vector<16x32xf32>
    %266 = arith.mulf %265, %265 : vector<16x32xf32>
    %cst_65 = arith.constant dense<0.000000e+00> : vector<16xf32>
    %267 = vector.multi_reduction <add>, %266, %cst_65 [1] : vector<16x32xf32> to vector<16xf32>
    %268 = vector.shape_cast %267 : vector<16xf32> to vector<16x1xf32>
    %cst_66 = arith.constant 0.0322580636 : f32
    %269 = vector.broadcast %cst_66 : f32 to vector<16x1xf32>
    %270 = arith.mulf %268, %269 : vector<16x1xf32>
    %271 = math.sqrt %270 : vector<16x1xf32>
    %cst_67 = arith.constant 9.99999997E-7 : f32
    %272 = vector.broadcast %cst_67 : f32 to vector<16x1xf32>
    %273 = arith.addf %271, %272 : vector<16x1xf32>
    %274 = tpu.reciprocal %273 {approx = true} : vector<16x1xf32> -> vector<16x1xf32>
    %275 = vector.broadcast %274 : vector<16x1xf32> to vector<16x32xf32>
    %276 = arith.mulf %265, %275 : vector<16x32xf32>
    %277 = vector.broadcast %258 : vector<1x32xf32> to vector<16x32xf32>
    %278 = arith.mulf %277, %276 : vector<16x32xf32>
    %279 = vector.broadcast %259 : vector<1x32xf32> to vector<16x32xf32>
    %280 = arith.addf %278, %279 : vector<16x32xf32>
    %c0_68 = arith.constant 0 : index
    %c0_69 = arith.constant 0 : index
    %281 = vector.load %arg6[%c0_68, %c0_69] : memref<16x32xf32, #tpu.memory_space<vmem>>, vector<16x32xf32>
    tpu.vector_store %arg6[%c0_68, %c0_69], %280 {strides = array<i32>} : memref<16x32xf32, #tpu.memory_space<vmem>>, vector<16x32xf32>,
    return
  }
}

</mosaic_0001>

<bundles_post_ra>
// kernel: encoder_forward.1
= control target key start
LH: loop header
LB: loop body
LE: loop exit
PB: predicated region body
PF: predicated region fallthrough
CT: control target
= control target key end

     0   :  { %11 = vsyncpa [#allocation3], 0  ;;  %s2649_s0 = inlined_call_operand.hbm [shape: f32[16,32], index: 0, kind: input, shape index: {}]   ;;  %s2650_s1 = inlined_call_operand.hbm [shape: f32[18,96], index: 1, kind: input, shape index: {}]   ;;  %s2651_s2 = inlined_call_operand.vmem [shape: f32[2,32,96], index: 2, kind: input, shape index: {}]   ;;  %s2652_s3 = inlined_call_operand.vmem [shape: f32[2,32,32], index: 3, kind: input, shape index: {}]   ;;  %s2653_s4 = inlined_call_operand.vmem [shape: f32[2,32,64], index: 4, kind: input, shape index: {}]   ;;  %s2654_s5 = inlined_call_operand.vmem [shape: f32[2,64,32], index: 5, kind: input, shape index: {}]   ;;  %s2655_s6 = inlined_call_operand.hbm [shape: f32[16,32], index: 6, kind: output, shape index: {}]  }
   0x1   :  { %12 = vsyncpa [#allocation6], 0 }
   0x2   :  { %13 = vsyncpa [#allocation4], 0  ;;  %s18_s23 = sshll.u32 %s2649_s0, 4  ;;  %s2073_s24 = smov [#allocation2]   ;;  %s19_s23 = int_to_ptr.hbm [resolvable:$true] %s18_s23 }
   0x3   :  { %s20_s25 = sshll.u32 %s2073_s24, 4  ;;  %s31_s28 = sshll.u32 %s2650_s1, 4  ;;  %s21_s25 = int_to_ptr.vmem [resolvable:$true] %s20_s25  ;;  %s32_s28 = int_to_ptr.hbm [resolvable:$true] %s31_s28 }
   0x4   :  { %s2074_s29 = smov 128   ;;  %s2075_s30 = smov 8  }
   0x5   :  { %26 = dma.hbm_to_vmem [thread:$0]  %s19_s23, 256, %s21_s25, [#allocation3], %s2074_s29, %s2074_s29, %s2075_s30  }
   0x6   :  { %s2076_s7 = smov [#allocation5]  }
   0x7   :  { %s33_s8 = sshll.u32 %s2076_s7, 4  ;;  %s34_s8 = int_to_ptr.vmem [resolvable:$true] %s33_s8 }
   0x8   :  { %39 = dma.hbm_to_vmem [thread:$0]  %s32_s28, 384, %s34_s8, [#allocation6], %s2074_s29, %s2074_s29, %s2075_s30  }
   0x9   :  { %2067 = dma.done.wait [#allocation3], 256  }
   0xa   :  { %2068 = vsyncadd [#allocation3], 4294967040 }
   0xb   :  { %2069 = dma.done.wait [#allocation6], 384  }
   0xc   :  { %2070 = vsyncadd [#allocation6], 4294966912  ;;  %vm61_vm0 = vcmask 261120   ;;  %v2133_v0 = vld [vmem:[#allocation2] sm:$0xff]  ;;  %v2137_v2 = vld [vmem:[#allocation2 + $0x8] sm:$0xff]  ;;  %v2077_v4 = vmov 32.0  }
   0xd   :  { %v62_v1 = vsel %vm61_vm0, %v2133_v0, 0.0  ;;  %v65_v3 = vsel %vm61_vm0, %v2137_v2, 0.0  ;;  %1889 = vrcp.f32 %v2077_v4  ;;  %v128_v21 = vld [vmem:[%s2651_s2 + $0x18] sm:$0xff]  ;;  %v127_v22 = vld [vmem:[%s2651_s2 + $0x10] sm:$0xff]  ;;  %v126_v23 = vld [vmem:[%s2651_s2 + $0x8] sm:$0xff]  ;;  %s2078_s15 = smov 104  }
   0xe   :  { %63 = vadd.xlane.f32.xlu0 %v62_v1  ;;  %148 = vmatpush.msra.mxu0 %v128_v21  ;;  %v125_v24 = vld [vmem:[%s2651_s2] sm:$0xff]  ;;  %v2161_v47 = vld [vmem:[#allocation5] sm:$0xff]  ;;  %s2079_s16 = smov 120   ;;  %s2080_s17 = smov 96   ;;  %vm175_vm6 = vcmask 64512   ;;  %vm704_vm7 = vcmask 130048  }
   0xf   :  { %v119_v50 = vperm.slane %v2161_v47, 0  ;;  %v122_v55 = vperm.slane %v2161_v47, 1  ;;  %v129_v62 = vperm.slane %v2161_v47, 2  ;;  %s2081_s18 = smov 112   ;;  %s2082_s19 = smov 64   ;;  %vm707_vm8 = vcmask 195584  }
  0x10   :  { %149 = vmatpush.msra.mxu0 %v127_v22  ;;  %s2083_s20 = smov 16   ;;  %s2084_s21 = smov 24   ;;  %vm847_vm13 = vcmask 523264  }
  0x12   :  { %150 = vmatpush.msra.mxu0 %v126_v23 }
  0x13   :  { %v1890_v5 = vpop.eup %1889 }
  0x14   :  { %v69_v6 = vmul.f32 32.0, %v1890_v5  ;;  %vm73_vm1 = vweird.f32 %v1890_v5  ;;  %151 = vmatpush.msra.mxu0 %v125_v24 }
  0x16   :  { %66 = vadd.xlane.f32.xlu0 %v65_v3  ;;  %v70_v7 = vsub.f32 1.0, %v69_v6 }
  0x18   :  { %v71_v8 = vmul.f32 %v1890_v5, %v70_v7 }
  0x1a   :  { %v72_v9 = vadd.f32 %v1890_v5, %v71_v8 }
  0x1c   :  { %v2141_v10 = vsel %vm73_vm1, %v1890_v5, %v72_v9 }
  0x81   :  { %v64_v11 = vpop.xlane.xlu0 %63 }
  0x82   :  { %v75_v12 = vmul.f32 %v2141_v10, %v64_v11 }
  0x84   :  { %v77_v13 = vsub.f32 %v2133_v0, %v75_v12 }
  0x86   :  { %v79_v14 = vmul.f32 %v77_v13, %v77_v13 }
  0x88   :  { %v81_v15 = vsel %vm61_vm0, %v79_v14, 0.0 }
  0x89   :  { %82 = vadd.xlane.f32.xlu1 %v81_v15  ;;  %v67_v16 = vpop.xlane.xlu0 %66 }
  0x8a   :  { %v76_v17 = vmul.f32 %v2141_v10, %v67_v16 }
  0x8c   :  { %v78_v18 = vsub.f32 %v2137_v2, %v76_v17 }
  0x8e   :  { %v80_v19 = vmul.f32 %v78_v18, %v78_v18 }
  0x90   :  { %v84_v20 = vsel %vm61_vm0, %v80_v19, 0.0 }
  0x91   :  { %85 = vadd.xlane.f32.xlu1 %v84_v20 }
  0xfc   :  { %v83_v25 = vpop.xlane.xlu1 %82 }
  0xfd   :  { %v87_v26 = vmul.f32 0.032258064, %v83_v25 }
  0xff   :  { %1891 = vrsqrt.f32 %v87_v26  ;;  %vm96_vm2 = vcmp.eq.f32.partialorder %v87_v26, inf  ;;  %v99_v39 = vand.u32 2147483648, %v87_v26  ;;  %vm98_vm3 = vcmp.eq.f32.partialorder %v87_v26, 0.0 }
 0x104   :  { %v86_v27 = vpop.xlane.xlu1 %85 }
 0x105   :  { %v1892_v28 = vpop.eup %1891  ;;  %v88_v29 = vmul.f32 0.032258064, %v86_v27 }
 0x106   :  { %v90_v30 = vmul.f32 %v1892_v28, %v87_v26 }
 0x107   :  { %1893 = vrsqrt.f32 %v88_v29  ;;  %vm108_vm4 = vcmp.eq.f32.partialorder %v88_v29, inf  ;;  %v111_v46 = vand.u32 2147483648, %v88_v29  ;;  %vm110_vm5 = vcmp.eq.f32.partialorder %v88_v29, 0.0 }
 0x108   :  { %v91_v31 = vmul.f32 %v1892_v28, %v90_v30 }
 0x10a   :  { %v92_v32 = vmul.f32 0.5, %v91_v31 }
 0x10c   :  { %v93_v33 = vsub.f32 1.5, %v92_v32 }
 0x10d   :  { %v1894_v34 = vpop.eup %1893 }
 0x10e   :  { %v102_v35 = vmul.f32 %v1894_v34, %v88_v29  ;;  %v94_v36 = vmul.f32 %v1892_v28, %v93_v33 }
 0x110   :  { %v103_v37 = vmul.f32 %v1894_v34, %v102_v35  ;;  %v95_v38 = vmul.f32 %v94_v36, %v87_v26 }
 0x112   :  { %v97_v40 = vsel %vm96_vm2, %v87_v26, %v95_v38  ;;  %v104_v41 = vmul.f32 0.5, %v103_v37 }
 0x113   :  { %v100_v42 = vsel %vm98_vm3, %v99_v39, %v97_v40 }
 0x114   :  { %v113_v43 = vadd.f32 1e-06, %v100_v42  ;;  %v105_v44 = vsub.f32 1.5, %v104_v41 }
 0x116   :  { %1895 = vrcp.f32 %v113_v43  ;;  %v106_v45 = vmul.f32 %v1894_v34, %v105_v44 }
 0x118   :  { %v107_v48 = vmul.f32 %v106_v45, %v88_v29 }
 0x11a   :  { %v109_v49 = vsel %vm108_vm4, %v88_v29, %v107_v48 }
 0x11b   :  { %v112_v51 = vsel %vm110_vm5, %v111_v46, %v109_v49 }
 0x11c   :  { %v1896_v52 = vpop.eup %1895  ;;  %v114_v53 = vadd.f32 1e-06, %v112_v51 }
 0x11d   :  { %v117_v54 = vmul.f32 %v1896_v52, %v77_v13 }
 0x11e   :  { %1897 = vrcp.f32 %v114_v53 }
 0x11f   :  { %v120_v56 = vmul.f32 %v119_v50, %v117_v54 }
 0x121   :  { %v123_v57 = vadd.f32 %v122_v55, %v120_v56 }
 0x123   :  { %1767 = vmatmul.msk.f32.vlgmr.msra.gmra.mxu0 %vm61_vm0, %v123_v57 }
 0x124   :  { %v1898_v58 = vpop.eup %1897 }
 0x125   :  { %v118_v59 = vmul.f32 %v1898_v58, %v78_v18 }
 0x127   :  { %v121_v60 = vmul.f32 %v119_v50, %v118_v59 }
 0x129   :  { %v124_v61 = vadd.f32 %v122_v55, %v121_v60 }
 0x12b   :  { %1768 = vmatmul.msk.f32.gmra.mxu0 %vm61_vm0, %v124_v61 }
 0x1a0   :  { %v153_v63 = vpop.f32.mrf.mxu0 }
 0x1a1   :  { %v2168_v1 = vadd.f32 %v153_v63, %v129_v62 }
 0x1a3   :  { %169 = vrot.lane.b32.xlu0 %v2168_v1, %s2078_s15  ;;  %161 = vrot.lane.b32.xlu2 %v2168_v1, %s2079_s16 }
 0x1a8   :  { %v156_v3 = vpop.f32.mrf.mxu0 }
 0x1a9   :  { %v2174_v4 = vadd.f32 %v156_v3, %v129_v62 }
 0x1ab   :  { %171 = vrot.lane.b32.xlu1 %v2174_v4, %s2078_s15  ;;  %173 = vrot.lane.b32.xlu0 %v2168_v1, %s2080_s17 }
 0x1ac   :  { %165 = vrot.lane.b32.xlu2 %v2168_v1, %s2081_s18 }
 0x1b4   :  { %163 = vrot.lane.b32.xlu2 %v2174_v4, %s2079_s16 }
 0x1bc   :  { %167 = vrot.lane.b32.xlu2 %v2174_v4, %s2081_s18 }
 0x1fd   :  { %v2186_v5 = vpop.permute.xlu2 %161 }
 0x1fe   :  { %200 = vrot.lane.b32.xlu2 %v2186_v5, %s2080_s17 }
 0x206   :  { %v166_v6 = vpop.permute.xlu2 %165  ;;  %278 = vrot.lane.b32.xlu2 %v2174_v4, %s2080_s17 }
 0x207   :  { %226 = vrot.lane.b32.xlu1 %v166_v6, %s2080_s17 }
 0x20e   :  { %v2193_v7 = vpop.permute.xlu2 %163 }
 0x20f   :  { %304 = vrot.lane.b32.xlu1 %v2193_v7, %s2080_s17 }
 0x215   :  { %v2197_v8 = vpop.permute.xlu0 %169 }
 0x216   :  { %252 = vrot.lane.b32.xlu0 %v2197_v8, %s2080_s17  ;;  %v2201_v12 = vpop.permute.xlu2 %167  ;;  %v1864_v44 = vpack.i.bf16 %v2186_v5, %v2197_v8 }
 0x21d   :  { %v172_v9 = vpop.permute.xlu1 %171  ;;  %v174_v11 = vpop.permute.xlu0 %173 }
 0x21e   :  { %1769 = vmatpush.xpose.msk.msra.mxu1 %vm175_vm6, %v174_v11  ;;  %356 = vrot.lane.b32.xlu2 %v172_v9, %s2080_s17  ;;  %v1869_v36 = vpack.i.bf16 %v172_v9, %v166_v6 }
 0x21f   :  { %330 = vrot.lane.b32.xlu0 %v2201_v12, %s2080_s17 }
 0x221   :  { %1770 = vmatmul.msk.f32.vlgmr.msra.gmra.mxu1 %vm175_vm6, %v2168_v1 }
 0x258   :  { %v201_v13 = vpop.permute.xlu2 %200 }
 0x259   :  { %1771 = vmatpush.xpose.msk.msra.mxu3 %vm175_vm6, %v201_v13 }
 0x25c   :  { %1772 = vmatmul.msk.f32.vlgmr.msra.gmra.mxu3 %vm175_vm6, %v2186_v5 }
 0x260   :  { %v279_v14 = vpop.permute.xlu2 %278 }
 0x261   :  { %1777 = vmatpush.xpose.msk.msra.mxu2 %vm175_vm6, %v279_v14 }
 0x264   :  { %1778 = vmatmul.msk.f32.vlgmr.msra.gmra.mxu2 %vm175_vm6, %v2174_v4 }
 0x278   :  { %v357_v15 = vpop.permute.xlu2 %356 }
 0x279   :  { %v227_v16 = vpop.permute.xlu1 %226  ;;  %1783 = vmatpush.xpose.msk.msrb.mxu2 %vm175_vm6, %v357_v15 }
 0x27a   :  { %1773 = vmatpush.xpose.msk.msrb.mxu3 %vm175_vm6, %v227_v16  ;;  %v1874_v16 = vpack.i.bf16 %v2201_v12, %v2193_v7 }
 0x27c   :  { %1784 = vmatmul.msk.f32.vlgmr.msrb.gmra.mxu2 %vm175_vm6, %v172_v9 }
 0x27d   :  { %1774 = vmatmul.msk.f32.vlgmr.msrb.gmra.mxu3 %vm175_vm6, %v166_v6 }
 0x281   :  { %v305_v17 = vpop.permute.xlu1 %304 }
 0x282   :  { %1779 = vmatpush.xpose.msk.msra.mxu3 %vm175_vm6, %v305_v17 }
 0x285   :  { %1780 = vmatmul.msk.f32.vlgmr.msra.gmra.mxu3 %vm175_vm6, %v2193_v7 }
 0x288   :  { %v253_v18 = vpop.permute.xlu0 %252 }
 0x289   :  { %1775 = vmatpush.xpose.msk.msrb.mxu1 %vm175_vm6, %v253_v18 }
 0x28c   :  { %1776 = vmatmul.msk.f32.vlgmr.msrb.gmra.mxu1 %vm175_vm6, %v2197_v8 }
 0x291   :  { %v331_v19 = vpop.permute.xlu0 %330 }
 0x292   :  { %1781 = vmatpush.xpose.msk.msra.mxu1 %vm175_vm6, %v331_v19 }
 0x295   :  { %1782 = vmatmul.msk.f32.vlgmr.msra.gmra.mxu1 %vm175_vm6, %v2201_v12 }
 0x29e   :  { %v197_v25 = vpop.f32.mrf.mxu1 }
 0x29f   :  { %v382_v35 = vsel %vm175_vm6, %v197_v25, -inf }
 0x2df   :  { %v223_v20 = vpop.f32.mrf.mxu3 }
 0x2e0   :  { %v385_v21 = vsel %vm175_vm6, %v223_v20, -inf }
 0x2e1   :  { %386 = vmax.xlane.f32.xlu1 %v385_v21 }
 0x2e7   :  { %v2229_v22 = vpop.f32.mrf.mxu2 }
 0x2e8   :  { %v394_v23 = vsel %vm175_vm6, %v2229_v22, -inf }
 0x2e9   :  { %395 = vmax.xlane.f32.xlu1 %v394_v23 }
 0x2ff   :  { %v379_v31 = vpop.f32.mrf.mxu2 }
 0x300   :  { %v249_v24 = vpop.f32.mrf.mxu3  ;;  %v403_v33 = vsel %vm175_vm6, %v379_v31, -inf }
 0x301   :  { %v388_v26 = vsel %vm175_vm6, %v249_v24, -inf }
 0x302   :  { %389 = vmax.xlane.f32.xlu0 %v388_v26 }
 0x308   :  { %v2234_v27 = vpop.f32.mrf.mxu3 }
 0x309   :  { %v275_v28 = vpop.f32.mrf.mxu1  ;;  %v397_v29 = vsel %vm175_vm6, %v2234_v27, -inf }
 0x30a   :  { %398 = vmax.xlane.f32.xlu1 %v397_v29  ;;  %v391_v30 = vsel %vm175_vm6, %v275_v28, -inf }
 0x30b   :  { %392 = vmax.xlane.f32.xlu2 %v391_v30 }
 0x312   :  { %v353_v32 = vpop.f32.mrf.mxu1 }
 0x313   :  { %v400_v34 = vsel %vm175_vm6, %v353_v32, -inf  ;;  %404 = vmax.xlane.f32.xlu2 %v403_v33 }
 0x314   :  { %401 = vmax.xlane.f32.xlu0 %v400_v34 }
 0x31b   :  { %383 = vmax.xlane.f32.xlu2 %v382_v35 }
 0x323   :  { %1870 = vrot.lane.b32.xlu1 %v1869_v36, %s2082_s19 }
 0x354   :  { %v387_v37 = vpop.xlane.xlu1 %386 }
 0x355   :  { %v407_v38 = vsub.f32 %v223_v20, %v387_v37 }
 0x357   :  { %v416_v39 = vmul.f32 1.442695, %v407_v38 }
 0x359   :  { %1899 = vpow2.f32 %v416_v39 }
 0x35c   :  { %v396_v52 = vpop.xlane.xlu1 %395 }
 0x35f   :  { %v2243_v40 = vpop.eup %1899 }
 0x360   :  { %v433_v41 = vsel %vm175_vm6, %v2243_v40, 0.0 }
 0x361   :  { %434 = vadd.xlane.f32.xlu2 %v433_v41 }
 0x375   :  { %v390_v42 = vpop.xlane.xlu0 %389 }
 0x376   :  { %v408_v43 = vsub.f32 %v249_v24, %v390_v42 }
 0x378   :  { %v418_v45 = vmul.f32 1.442695, %v408_v43 }
 0x379   :  { %1865 = vrot.lane.b32.xlu2 %v1864_v44, %s2082_s19 }
 0x37a   :  { %1901 = vpow2.f32 %v418_v45 }
 0x37d   :  { %v399_v60 = vpop.xlane.xlu1 %398 }
 0x37e   :  { %v393_v46 = vpop.xlane.xlu2 %392  ;;  %v411_v17 = vsub.f32 %v2234_v27, %v399_v60  ;;  %v713_v60 = vld [vmem:[%s2652_s3 + $0x18] sm:$0xff] }
 0x37f   :  { %v409_v48 = vsub.f32 %v275_v28, %v393_v46 }
 0x380   :  { %v2250_v49 = vpop.eup %1901  ;;  %v424_v18 = vmul.f32 1.442695, %v411_v17 }
 0x381   :  { %v420_v50 = vmul.f32 1.442695, %v409_v48  ;;  %v436_v51 = vsel %vm175_vm6, %v2250_v49, 0.0 }
 0x382   :  { %437 = vadd.xlane.f32.xlu1 %v436_v51 }
 0x383   :  { %1903 = vpow2.f32 %v420_v50 }
 0x386   :  { %v405_v53 = vpop.xlane.xlu2 %404 }
 0x387   :  { %v402_v54 = vpop.xlane.xlu0 %401  ;;  %v413_v58 = vsub.f32 %v379_v31, %v405_v53 }
 0x388   :  { %v412_v55 = vsub.f32 %v353_v32, %v402_v54 }
 0x389   :  { %v1904_v56 = vpop.eup %1903  ;;  %v428_v61 = vmul.f32 1.442695, %v413_v58 }
 0x38a   :  { %v426_v57 = vmul.f32 1.442695, %v412_v55  ;;  %v439_v59 = vsel %vm175_vm6, %v1904_v56, 0.0 }
 0x38b   :  { %440 = vadd.xlane.f32.xlu0 %v439_v59 }
 0x38c   :  { %1905 = vpow2.f32 %v426_v57 }
 0x38d   :  { %1907 = vpow2.f32 %v428_v61  ;;  %v712_v61 = vld [vmem:[%s2652_s3 + $0x10] sm:$0xff] }
 0x38e   :  { %v384_v62 = vpop.xlane.xlu2 %383 }
 0x38f   :  { %v406_v63 = vsub.f32 %v197_v25, %v384_v62 }
 0x391   :  { %v414_v6 = vmul.f32 1.442695, %v406_v63  ;;  %v711_v63 = vld [vmem:[%s2652_s3 + $0x8] sm:$0xff] }
 0x392   :  { %v2255_v3 = vpop.eup %1905 }
 0x393   :  { %v448_v5 = vsel %vm175_vm6, %v2255_v3, 0.0  ;;  %v1908_v11 = vpop.eup %1907  ;;  %1909 = vpow2.f32 %v414_v6 }
 0x394   :  { %449 = vadd.xlane.f32.xlu0 %v448_v5  ;;  %v451_v13 = vsel %vm175_vm6, %v1908_v11, 0.0  ;;  %1911 = vpow2.f32 %v424_v18 }
 0x395   :  { %v1871_v8 = vpop.permute.xlu1 %1870 }
 0x396   :  { %v1872_v9 = vunpack.i.l.bf16 %v1871_v8  ;;  %v1873_v28 = vunpack.i.h.bf16 %v1871_v8 }
 0x398   :  { %543 = vmatpush.msrb.mxu1 %v1872_v9 }
 0x399   :  { %v1910_v14 = vpop.eup %1909 }
 0x39a   :  { %v430_v15 = vsel %vm175_vm6, %v1910_v14, 0.0  ;;  %v1912_v19 = vpop.eup %1911 }
 0x39b   :  { %470 = vrot.lane.b32.xlu1 %v2168_v1, %s2082_s19  ;;  %v445_v20 = vsel %vm175_vm6, %v1912_v19, 0.0  ;;  %v410_v1 = vsub.f32 %v2229_v22, %v396_v52 }
 0x39c   :  { %452 = vadd.xlane.f32.xlu0 %v451_v13 }
 0x39d   :  { %v422_v21 = vmul.f32 1.442695, %v410_v1 }
 0x39f   :  { %1913 = vpow2.f32 %v422_v21  ;;  %v714_v21 = vperm.slane %v2161_v47, 3 }
 0x3a2   :  { %431 = vadd.xlane.f32.xlu2 %v430_v15 }
 0x3a5   :  { %v1914_v24 = vpop.eup %1913 }
 0x3a6   :  { %v442_v25 = vsel %vm175_vm6, %v1914_v24, 0.0 }
 0x3b0   :  { %1875 = vrot.lane.b32.xlu0 %v1874_v16, %s2082_s19 }
 0x3c5   :  { %446 = vadd.xlane.f32.xlu1 %v445_v20 }
 0x3d4   :  { %v435_v23 = vpop.xlane.xlu2 %434 }
 0x3d5   :  { %1915 = vrcp.f32 %v435_v23 }
 0x3da   :  { %443 = vadd.xlane.f32.xlu0 %v442_v25 }
 0x3db   :  { %v1916_v7 = vpop.eup %1915 }
 0x3dc   :  { %v1866_v12 = vpop.permute.xlu2 %1865  ;;  %v463_v29 = vmul.f32 %v1916_v7, %v2243_v40 }
 0x3dd   :  { %v1867_v26 = vunpack.i.l.bf16 %v1866_v12  ;;  %v1868_v27 = vunpack.i.h.bf16 %v1866_v12 }
 0x3de   :  { %574 = vrot.lane.b32.xlu1 %v2174_v4, %s2082_s19 }
 0x3df   :  { %517 = vmatpush.msrb.mxu0 %v1868_v27  ;;  %569 = vmatpush.msra.mxu2 %v1867_v26 }
 0x3e0   :  { %1786 = vmatmul.msk.f32.vlgmr.msrb.gmra.mxu0 %vm175_vm6, %v463_v29 }
 0x3e1   :  { %673 = vmatpush.msrb.mxu2 %v1873_v28 }
 0x3f5   :  { %v438_v22 = vpop.xlane.xlu1 %437 }
 0x3f6   :  { %1917 = vrcp.f32 %v438_v22 }
 0x3fc   :  { %v1918_v30 = vpop.eup %1917 }
 0x3fd   :  { %v464_v31 = vmul.f32 %v1918_v30, %v2250_v49 }
 0x3fe   :  { %v441_v32 = vpop.xlane.xlu0 %440 }
 0x3ff   :  { %1787 = vmatmul.msk.f32.vlgmr.msrb.gmra.mxu1 %vm175_vm6, %v464_v31  ;;  %1919 = vrcp.f32 %v441_v32 }
 0x405   :  { %v1920_v33 = vpop.eup %1919 }
 0x406   :  { %v465_v34 = vmul.f32 %v1920_v33, %v1904_v56 }
 0x407   :  { %v450_v35 = vpop.xlane.xlu0 %449 }
 0x408   :  { %1788 = vmatmul.msk.f32.vlgmr.msra.gmra.mxu2 %vm175_vm6, %v465_v34 }
 0x40d   :  { %v471_v4 = vpop.permute.xlu1 %470 }
 0x40e   :  { %491 = vmatpush.msrb.mxu3 %v471_v4  ;;  %v805_v4 = vld [vmem:[%s2653_s4 + $0x18] sm:$0xff] }
 0x40f   :  { %v453_v36 = vpop.xlane.xlu0 %452 }
 0x410   :  { %1921 = vrcp.f32 %v453_v36  ;;  %v804_v36 = vld [vmem:[%s2653_s4 + $0x10] sm:$0xff] }
 0x415   :  { %v432_v37 = vpop.xlane.xlu2 %431 }
 0x416   :  { %v1922_v38 = vpop.eup %1921  ;;  %1923 = vrcp.f32 %v432_v37  ;;  %v803_v37 = vld [vmem:[%s2653_s4 + $0x8] sm:$0xff] }
 0x417   :  { %v469_v39 = vmul.f32 %v1922_v38, %v1908_v11  ;;  %1925 = vrcp.f32 %v450_v35  ;;  %v802_v38 = vld [vmem:[%s2653_s4] sm:$0xff] }
 0x419   :  { %1792 = vmatmul.msk.f32.vlgmr.msrb.gmra.mxu2 %vm175_vm6, %v469_v39 }
 0x41c   :  { %v1924_v40 = vpop.eup %1923 }
 0x41d   :  { %v462_v41 = vmul.f32 %v1924_v40, %v1910_v14  ;;  %v1926_v42 = vpop.eup %1925 }
 0x41e   :  { %v468_v46 = vmul.f32 %v1926_v42, %v2255_v3  ;;  %v710_v3 = vld [vmem:[%s2652_s3] sm:$0xff] }
 0x41f   :  { %1785 = vmatmul.msk.f32.vlgmr.msrb.gmra.mxu3 %vm175_vm6, %v462_v41 }
 0x422   :  { %v1876_v43 = vpop.permute.xlu0 %1875 }
 0x423   :  { %v1878_v44 = vunpack.i.h.bf16 %v1876_v43  ;;  %v1877_v45 = vunpack.i.l.bf16 %v1876_v43 }
 0x425   :  { %621 = vmatpush.msra.mxu0 %v1877_v45  ;;  %647 = vmatpush.msra.mxu1 %v1878_v44 }
 0x426   :  { %1791 = vmatmul.msk.f32.vlgmr.msra.gmra.mxu1 %vm175_vm6, %v468_v46 }
 0x427   :  { %825 = vmatpush.msrb.mxu0 %v805_v4 }
 0x429   :  { %826 = vmatpush.msrb.mxu0 %v804_v36 }
 0x42b   :  { %827 = vmatpush.msrb.mxu0 %v803_v37 }
 0x42d   :  { %828 = vmatpush.msrb.mxu0 %v802_v38 }
 0x438   :  { %v447_v48 = vpop.xlane.xlu1 %446 }
 0x439   :  { %1927 = vrcp.f32 %v447_v48 }
 0x43f   :  { %v1928_v49 = vpop.eup %1927 }
 0x440   :  { %v467_v50 = vmul.f32 %v1928_v49, %v1912_v19 }
 0x442   :  { %1790 = vmatmul.msk.f32.vlgmr.msra.gmra.mxu0 %vm175_vm6, %v467_v50 }
 0x44d   :  { %v444_v51 = vpop.xlane.xlu0 %443 }
 0x44e   :  { %1929 = vrcp.f32 %v444_v51 }
 0x450   :  { %v575_v52 = vpop.permute.xlu1 %574 }
 0x451   :  { %595 = vmatpush.msra.mxu3 %v575_v52 }
 0x453   :  { %733 = vmatpush.msrb.mxu3 %v713_v60 }
 0x454   :  { %v1930_v53 = vpop.eup %1929 }
 0x455   :  { %v466_v54 = vmul.f32 %v1930_v53, %v1914_v24  ;;  %734 = vmatpush.msrb.mxu3 %v712_v61  ;;  %v796_v53 = vperm.slane %v2161_v47, 4  ;;  %v845_v61 = vld [vmem:[%s2654_s5 + $0x38] sm:$0xff] }
 0x456   :  { %862 = vmatpush.msrb.mxu1 %v845_v61 }
 0x457   :  { %1789 = vmatmul.msk.f32.vlgmr.msra.gmra.mxu3 %vm175_vm6, %v466_v54 }
 0x458   :  { %735 = vmatpush.msrb.mxu3 %v711_v63 }
 0x45a   :  { %736 = vmatpush.msrb.mxu3 %v710_v3  ;;  %v843_v3 = vld [vmem:[%s2654_s5 + $0x28] sm:$0xff] }
 0x45d   :  { %v519_v55 = vpop.f32.mrf.mxu0 }
 0x45e   :  { %680 = vrot.lane.b32.xlu1 %v519_v55, %s2075_s30 }
 0x47c   :  { %v545_v56 = vpop.f32.mrf.mxu1 }
 0x47d   :  { %688 = vrot.lane.b32.xlu1 %v545_v56, %s2083_s20  ;;  %v799_v56 = vperm.slane %v2161_v47, 5 }
 0x48b   :  { %v571_v57 = vpop.f32.mrf.mxu2 }
 0x48c   :  { %696 = vrot.lane.b32.xlu2 %v571_v57, %s2084_s21 }
 0x49c   :  { %v675_v62 = vpop.f32.mrf.mxu2 }
 0x4a2   :  { %v493_v6 = vpop.f32.mrf.mxu3 }
 0x4a3   :  { %v649_v58 = vpop.f32.mrf.mxu1 }
 0x4a4   :  { %690 = vrot.lane.b32.xlu0 %v649_v58, %s2083_s20 }
 0x4bf   :  { %v623_v59 = vpop.f32.mrf.mxu0 }
 0x4c0   :  { %682 = vrot.lane.b32.xlu1 %v623_v59, %s2075_s30 }
 0x4c8   :  { %698 = vrot.lane.b32.xlu1 %v675_v62, %s2084_s21  ;;  %v844_v62 = vld [vmem:[%s2654_s5 + $0x30] sm:$0xff] }
 0x4c9   :  { %863 = vmatpush.msrb.mxu1 %v844_v62 }
 0x4cb   :  { %864 = vmatpush.msrb.mxu1 %v843_v3  ;;  %v2403_v3 = vld [vmem:[#allocation5 + $0x8] sm:$0xff] }
 0x4d0   :  { %v681_v5 = vpop.permute.xlu1 %680 }
 0x4d1   :  { %v702_v8 = vsel %vm175_vm6, %v493_v6, %v681_v5  ;;  %v842_v6 = vld [vmem:[%s2654_s5 + $0x20] sm:$0xff] }
 0x4d2   :  { %865 = vmatpush.msrb.mxu1 %v842_v6 }
 0x4da   :  { %v597_v16 = vpop.f32.mrf.mxu3 }
 0x4e6   :  { %v697_v11 = vpop.permute.xlu2 %696 }
 0x4ef   :  { %v689_v9 = vpop.permute.xlu1 %688 }
 0x4f0   :  { %v705_v13 = vsel %vm704_vm7, %v702_v8, %v689_v9  ;;  %v841_v9 = vld [vmem:[%s2654_s5 + $0x18] sm:$0xff] }
 0x4f1   :  { %v708_v14 = vsel %vm707_vm8, %v705_v13, %v697_v11  ;;  %866 = vmatpush.msrb.mxu1 %v841_v9  ;;  %v932_v9 = vperm.slane %v2403_v3, 1 }
 0x4f2   :  { %1793 = vmatmul.msk.f32.vlgmr.msrb.gmra.mxu3 %vm61_vm0, %v708_v14 }
 0x516   :  { %v691_v18 = vpop.permute.xlu0 %690 }
 0x532   :  { %v683_v15 = vpop.permute.xlu1 %682 }
 0x533   :  { %v703_v17 = vsel %vm175_vm6, %v597_v16, %v683_v15 }
 0x534   :  { %v706_v20 = vsel %vm704_vm7, %v703_v17, %v691_v18 }
 0x53a   :  { %v699_v19 = vpop.permute.xlu1 %698 }
 0x53b   :  { %v709_v1 = vsel %vm707_vm8, %v706_v20, %v699_v19 }
 0x53c   :  { %1794 = vmatmul.msk.f32.gmra.mxu3 %vm61_vm0, %v709_v1 }
 0x575   :  { %v738_v23 = vpop.f32.mrf.mxu3 }
 0x576   :  { %v739_v24 = vadd.f32 %v738_v23, %v714_v21 }
 0x578   :  { %v2311_v25 = vadd.f32 %v739_v24, %v2133_v0  ;;  %v840_v24 = vld [vmem:[%s2654_s5 + $0x10] sm:$0xff] }
 0x579   :  { %867 = vmatpush.msrb.mxu1 %v840_v24 }
 0x57a   :  { %v746_v7 = vsel %vm61_vm0, %v2311_v25, 0.0 }
 0x57b   :  { %747 = vadd.xlane.f32.xlu1 %v746_v7  ;;  %v839_v7 = vld [vmem:[%s2654_s5 + $0x8] sm:$0xff] }
 0x57c   :  { %868 = vmatpush.msrb.mxu1 %v839_v7 }
 0x5bf   :  { %v741_v12 = vpop.f32.mrf.mxu3 }
 0x5c0   :  { %v742_v26 = vadd.f32 %v741_v12, %v714_v21  ;;  %v838_v12 = vld [vmem:[%s2654_s5] sm:$0xff] }
 0x5c1   :  { %869 = vmatpush.msrb.mxu1 %v838_v12 }
 0x5c2   :  { %v2316_v27 = vadd.f32 %v742_v26, %v2137_v2  ;;  %v806_v26 = vperm.slane %v2161_v47, 6 }
 0x5c4   :  { %v749_v28 = vsel %vm61_vm0, %v2316_v27, 0.0 }
 0x5c5   :  { %750 = vadd.xlane.f32.xlu2 %v749_v28 }
 0x5ee   :  { %v748_v29 = vpop.xlane.xlu1 %747 }
 0x5ef   :  { %v752_v22 = vmul.f32 %v748_v29, %v2141_v10 }
 0x5f1   :  { %v754_v30 = vsub.f32 %v2311_v25, %v752_v22 }
 0x5f3   :  { %v756_v0 = vmul.f32 %v754_v30, %v754_v30 }
 0x5f5   :  { %v758_v31 = vsel %vm61_vm0, %v756_v0, 0.0 }
 0x5f6   :  { %759 = vadd.xlane.f32.xlu0 %v758_v31 }
 0x638   :  { %v751_v32 = vpop.xlane.xlu2 %750 }
 0x639   :  { %v753_v33 = vmul.f32 %v751_v32, %v2141_v10  ;;  %v846_v32 = vperm.slane %v2161_v47, 7 }
 0x63b   :  { %v2325_v34 = vsub.f32 %v2316_v27, %v753_v33 }
 0x63d   :  { %v757_v2 = vmul.f32 %v2325_v34, %v2325_v34 }
 0x63f   :  { %v761_v35 = vsel %vm61_vm0, %v757_v2, 0.0 }
 0x640   :  { %762 = vadd.xlane.f32.xlu1 %v761_v35 }
 0x669   :  { %v760_v39 = vpop.xlane.xlu0 %759 }
 0x66a   :  { %v764_v40 = vmul.f32 0.032258064, %v760_v39 }
 0x66c   :  { %1931 = vrsqrt.f32 %v764_v40  ;;  %vm773_vm9 = vcmp.eq.f32.partialorder %v764_v40, inf  ;;  %v776_v49 = vand.u32 2147483648, %v764_v40  ;;  %vm775_vm10 = vcmp.eq.f32.partialorder %v764_v40, 0.0 }
 0x672   :  { %v1932_v41 = vpop.eup %1931 }
 0x673   :  { %v767_v42 = vmul.f32 %v1932_v41, %v764_v40 }
 0x675   :  { %v768_v43 = vmul.f32 %v1932_v41, %v767_v42 }
 0x677   :  { %v769_v44 = vmul.f32 0.5, %v768_v43 }
 0x679   :  { %v770_v45 = vsub.f32 1.5, %v769_v44 }
 0x67b   :  { %v771_v46 = vmul.f32 %v1932_v41, %v770_v45 }
 0x67d   :  { %v772_v48 = vmul.f32 %v771_v46, %v764_v40  ;;  %v1802_v46 = vld [vmem:[%s2651_s2 + $0x38] sm:$0xff] }
 0x67e   :  { %959 = vmatpush.msra.mxu2 %v1802_v46 }
 0x67f   :  { %v774_v50 = vsel %vm773_vm9, %v764_v40, %v772_v48  ;;  %v1801_v48 = vld [vmem:[%s2651_s2 + $0x30] sm:$0xff] }
 0x680   :  { %v777_v51 = vsel %vm775_vm10, %v776_v49, %v774_v50  ;;  %v1800_v49 = vld [vmem:[%s2651_s2 + $0x28] sm:$0xff]  ;;  %960 = vmatpush.msra.mxu2 %v1801_v48  ;;  %v1799_v50 = vld [vmem:[%s2651_s2 + $0x20] sm:$0xff] }
 0x681   :  { %v790_v52 = vadd.f32 1e-06, %v777_v51 }
 0x682   :  { %961 = vmatpush.msra.mxu2 %v1800_v49 }
 0x683   :  { %1933 = vrcp.f32 %v790_v52 }
 0x684   :  { %962 = vmatpush.msra.mxu2 %v1799_v50 }
 0x689   :  { %v1934_v54 = vpop.eup %1933 }
 0x68a   :  { %v794_v55 = vmul.f32 %v1934_v54, %v754_v30 }
 0x68c   :  { %v797_v57 = vmul.f32 %v796_v53, %v794_v55 }
 0x68e   :  { %v800_v58 = vadd.f32 %v799_v56, %v797_v57 }
 0x690   :  { %1795 = vmatmul.msk.f32.vlgmr.msrb.gmra.mxu0 %vm61_vm0, %v800_v58 }
 0x6b3   :  { %v763_v59 = vpop.xlane.xlu1 %762 }
 0x6b4   :  { %v765_v60 = vmul.f32 0.032258064, %v763_v59 }
 0x6b6   :  { %1935 = vrsqrt.f32 %v765_v60  ;;  %vm785_vm11 = vcmp.eq.f32.partialorder %v765_v60, inf  ;;  %v788_v16 = vand.u32 2147483648, %v765_v60  ;;  %vm787_vm12 = vcmp.eq.f32.partialorder %v765_v60, 0.0 }
 0x6bc   :  { %v1936_v63 = vpop.eup %1935 }
 0x6bd   :  { %v779_v5 = vmul.f32 %v1936_v63, %v765_v60 }
 0x6bf   :  { %v780_v8 = vmul.f32 %v1936_v63, %v779_v5  ;;  %v929_v5 = vperm.slane %v2403_v3, 0 }
 0x6c1   :  { %v781_v11 = vmul.f32 0.5, %v780_v8 }
 0x6c3   :  { %v782_v13 = vsub.f32 1.5, %v781_v11 }
 0x6c5   :  { %v783_v14 = vmul.f32 %v1936_v63, %v782_v13 }
 0x6c7   :  { %v784_v15 = vmul.f32 %v783_v14, %v765_v60 }
 0x6c9   :  { %v786_v17 = vsel %vm785_vm11, %v765_v60, %v784_v15 }
 0x6ca   :  { %v789_v18 = vsel %vm787_vm12, %v788_v16, %v786_v17 }
 0x6cb   :  { %v791_v19 = vadd.f32 1e-06, %v789_v18 }
 0x6cd   :  { %1937 = vrcp.f32 %v791_v19 }
 0x6d3   :  { %v1938_v20 = vpop.eup %1937 }
 0x6d4   :  { %v795_v1 = vmul.f32 %v1938_v20, %v2325_v34 }
 0x6d6   :  { %v798_v21 = vmul.f32 %v796_v53, %v795_v1 }
 0x6d8   :  { %v801_v23 = vadd.f32 %v799_v56, %v798_v21 }
 0x6da   :  { %1796 = vmatmul.msk.f32.gmra.mxu0 %vm61_vm0, %v801_v23 }
 0x70d   :  { %v830_v28 = vpop.f32.mrf.mxu0 }
 0x70e   :  { %v831_v29 = vadd.f32 %v830_v28, %v806_v26 }
 0x710   :  { %v836_v22 = vmax.f32 %v831_v29, 0.0 }
 0x712   :  { %1797 = vmatmul.msk.f32.vlgmr.msrb.gmra.mxu1 %vm847_vm13, %v836_v22 }
 0x757   :  { %v833_v30 = vpop.f32.mrf.mxu0 }
 0x758   :  { %v834_v0 = vadd.f32 %v833_v30, %v806_v26  ;;  %v940_v30 = vperm.slane %v2403_v3, 2 }
 0x75a   :  { %v837_v31 = vmax.f32 %v834_v0, 0.0 }
 0x75c   :  { %1798 = vmatmul.msk.f32.gmra.mxu1 %vm847_vm13, %v837_v31 }
 0x78f   :  { %v871_v33 = vpop.f32.mrf.mxu1 }
 0x790   :  { %v872_v34 = vadd.f32 %v871_v33, %v846_v32 }
 0x792   :  { %v2376_v2 = vadd.f32 %v872_v34, %v2311_v25 }
 0x794   :  { %v879_v35 = vsel %vm61_vm0, %v2376_v2, 0.0 }
 0x795   :  { %880 = vadd.xlane.f32.xlu2 %v879_v35 }
 0x7d9   :  { %v874_v4 = vpop.f32.mrf.mxu1 }
 0x7da   :  { %v875_v36 = vadd.f32 %v874_v4, %v846_v32 }
 0x7dc   :  { %v2381_v37 = vadd.f32 %v875_v36, %v2316_v27 }
 0x7de   :  { %v882_v38 = vsel %vm61_vm0, %v2381_v37, 0.0 }
 0x7df   :  { %883 = vadd.xlane.f32.xlu1 %v882_v38 }
 0x808   :  { %v881_v39 = vpop.xlane.xlu2 %880 }
 0x809   :  { %v885_v47 = vmul.f32 %v881_v39, %v2141_v10 }
 0x80b   :  { %v887_v40 = vsub.f32 %v2376_v2, %v885_v47 }
 0x80d   :  { %v889_v25 = vmul.f32 %v887_v40, %v887_v40 }
 0x80f   :  { %v891_v41 = vsel %vm61_vm0, %v889_v25, 0.0 }
 0x810   :  { %892 = vadd.xlane.f32.xlu0 %v891_v41 }
 0x852   :  { %v884_v42 = vpop.xlane.xlu1 %883 }
 0x853   :  { %v886_v43 = vmul.f32 %v884_v42, %v2141_v10 }
 0x855   :  { %v888_v44 = vsub.f32 %v2381_v37, %v886_v43 }
 0x857   :  { %v890_v27 = vmul.f32 %v888_v44, %v888_v44 }
 0x859   :  { %v894_v45 = vsel %vm61_vm0, %v890_v27, 0.0 }
 0x85a   :  { %895 = vadd.xlane.f32.xlu2 %v894_v45 }
 0x883   :  { %v893_v51 = vpop.xlane.xlu0 %892 }
 0x884   :  { %v897_v52 = vmul.f32 0.032258064, %v893_v51 }
 0x886   :  { %1939 = vrsqrt.f32 %v897_v52  ;;  %vm906_vm14 = vcmp.eq.f32.partialorder %v897_v52, inf  ;;  %v909_v60 = vand.u32 2147483648, %v897_v52  ;;  %vm908_vm15 = vcmp.eq.f32.partialorder %v897_v52, 0.0 }
 0x88c   :  { %v1940_v53 = vpop.eup %1939 }
 0x88d   :  { %v900_v54 = vmul.f32 %v1940_v53, %v897_v52 }
 0x88f   :  { %v901_v55 = vmul.f32 %v1940_v53, %v900_v54 }
 0x891   :  { %v902_v56 = vmul.f32 0.5, %v901_v55 }
 0x893   :  { %v903_v57 = vsub.f32 1.5, %v902_v56 }
 0x895   :  { %v904_v58 = vmul.f32 %v1940_v53, %v903_v57 }
 0x897   :  { %v905_v59 = vmul.f32 %v904_v58, %v897_v52 }
 0x899   :  { %v907_v61 = vsel %vm906_vm14, %v897_v52, %v905_v59 }
 0x89a   :  { %v910_v62 = vsel %vm908_vm15, %v909_v60, %v907_v61 }
 0x89b   :  { %v923_v63 = vadd.f32 1e-06, %v910_v62 }
 0x89d   :  { %1941 = vrcp.f32 %v923_v63 }
 0x8a3   :  { %v1942_v6 = vpop.eup %1941 }
 0x8a4   :  { %v927_v8 = vmul.f32 %v1942_v6, %v887_v40 }
 0x8a6   :  { %v930_v11 = vmul.f32 %v929_v5, %v927_v8 }
 0x8a8   :  { %v933_v13 = vadd.f32 %v932_v9, %v930_v11 }
 0x8aa   :  { %1803 = vmatmul.msk.f32.vlgmr.msra.gmra.mxu2 %vm61_vm0, %v933_v13 }
 0x8cd   :  { %v896_v14 = vpop.xlane.xlu2 %895 }
 0x8ce   :  { %v898_v15 = vmul.f32 0.032258064, %v896_v14 }
 0x8d0   :  { %1943 = vrsqrt.f32 %v898_v15  ;;  %vm918_vm1 = vcmp.eq.f32.partialorder %v898_v15, inf  ;;  %v921_v23 = vand.u32 2147483648, %v898_v15  ;;  %vm920_vm2 = vcmp.eq.f32.partialorder %v898_v15, 0.0 }
 0x8d6   :  { %v1944_v16 = vpop.eup %1943 }
 0x8d7   :  { %v912_v17 = vmul.f32 %v1944_v16, %v898_v15 }
 0x8d9   :  { %v913_v18 = vmul.f32 %v1944_v16, %v912_v17 }
 0x8db   :  { %v914_v19 = vmul.f32 0.5, %v913_v18 }
 0x8dd   :  { %v915_v20 = vsub.f32 1.5, %v914_v19 }
 0x8df   :  { %v916_v1 = vmul.f32 %v1944_v16, %v915_v20 }
 0x8e1   :  { %v917_v21 = vmul.f32 %v916_v1, %v898_v15 }
 0x8e3   :  { %v919_v24 = vsel %vm918_vm1, %v898_v15, %v917_v21 }
 0x8e4   :  { %v922_v7 = vsel %vm920_vm2, %v921_v23, %v919_v24 }
 0x8e5   :  { %v924_v12 = vadd.f32 1e-06, %v922_v7 }
 0x8e7   :  { %1945 = vrcp.f32 %v924_v12 }
 0x8ed   :  { %v1946_v26 = vpop.eup %1945 }
 0x8ee   :  { %v928_v28 = vmul.f32 %v1946_v26, %v888_v44 }
 0x8f0   :  { %v931_v29 = vmul.f32 %v929_v5, %v928_v28 }
 0x8f2   :  { %v934_v22 = vadd.f32 %v932_v9, %v931_v29 }
 0x8f4   :  { %1804 = vmatmul.msk.f32.gmra.mxu2 %vm61_vm0, %v934_v22 }
 0x92d   :  { %v964_v0 = vpop.f32.mrf.mxu2 }
 0x92e   :  { %v2410_v31 = vadd.f32 %v964_v0, %v940_v30 }
 0x930   :  { %980 = vrot.lane.b32.xlu0 %v2410_v31, %s2078_s15  ;;  %976 = vrot.lane.b32.xlu1 %v2410_v31, %s2081_s18 }
 0x938   :  { %972 = vrot.lane.b32.xlu1 %v2410_v31, %s2079_s16 }
 0x977   :  { %v967_v32 = vpop.f32.mrf.mxu2 }
 0x978   :  { %v2418_v33 = vadd.f32 %v967_v32, %v940_v30 }
 0x97a   :  { %982 = vrot.lane.b32.xlu0 %v2418_v33, %s2078_s15  ;;  %978 = vrot.lane.b32.xlu2 %v2418_v33, %s2081_s18 }
 0x982   :  { %984 = vrot.lane.b32.xlu0 %v2410_v31, %s2080_s17  ;;  %974 = vrot.lane.b32.xlu2 %v2418_v33, %s2079_s16 }
 0x9a2   :  { %v2428_v34 = vpop.permute.xlu0 %980  ;;  %v2430_v35 = vpop.permute.xlu1 %976 }
 0x9a3   :  { %1062 = vrot.lane.b32.xlu2 %v2428_v34, %s2080_s17  ;;  %1036 = vrot.lane.b32.xlu1 %v2430_v35, %s2080_s17  ;;  %v1879_v8 = vpack.i.bf16 %v2428_v34, %v2430_v35 }
 0x9aa   :  { %v2436_v4 = vpop.permute.xlu1 %972 }
 0x9ab   :  { %1010 = vrot.lane.b32.xlu2 %v2436_v4, %s2080_s17 }
 0x9d4   :  { %v2440_v36 = vpop.permute.xlu2 %978 }
 0x9d5   :  { %1140 = vrot.lane.b32.xlu0 %v2440_v36, %s2080_s17 }
 0x9dc   :  { %v2444_v38 = vpop.permute.xlu2 %974 }
 0x9dd   :  { %1114 = vrot.lane.b32.xlu0 %v2444_v38, %s2080_s17 }
 0x9ec   :  { %v2448_v39 = vpop.permute.xlu0 %982 }
 0x9ed   :  { %1166 = vrot.lane.b32.xlu1 %v2448_v39, %s2080_s17 }
 0x9f4   :  { %v985_v47 = vpop.permute.xlu0 %984 }
 0x9f5   :  { %1805 = vmatpush.xpose.msk.msra.mxu3 %vm175_vm6, %v985_v47  ;;  %1088 = vrot.lane.b32.xlu1 %v2418_v33, %s2080_s17 }
 0x9f8   :  { %1806 = vmatmul.msk.f32.vlgmr.msra.gmra.mxu3 %vm175_vm6, %v2410_v31 }
 0x9fd   :  { %v1063_v40 = vpop.permute.xlu2 %1062 }
 0x9fe   :  { %1811 = vmatpush.xpose.msk.msrb.mxu3 %vm175_vm6, %v1063_v40 }
 0xa01   :  { %1812 = vmatmul.msk.f32.vlgmr.msrb.gmra.mxu3 %vm175_vm6, %v2428_v34 }
 0xa05   :  { %v1011_v25 = vpop.permute.xlu2 %1010 }
 0xa06   :  { %1807 = vmatpush.xpose.msk.msra.mxu0 %vm175_vm6, %v1011_v25 }
 0xa09   :  { %1808 = vmatmul.msk.f32.vlgmr.msra.gmra.mxu0 %vm175_vm6, %v2436_v4 }
 0xa15   :  { %v1037_v41 = vpop.permute.xlu1 %1036 }
 0xa16   :  { %1809 = vmatpush.xpose.msk.msrb.mxu2 %vm175_vm6, %v1037_v41 }
 0xa19   :  { %1810 = vmatmul.msk.f32.vlgmr.msrb.gmra.mxu2 %vm175_vm6, %v2430_v35 }
 0xa47   :  { %v1141_v42 = vpop.permute.xlu0 %1140 }
 0xa48   :  { %1817 = vmatpush.xpose.msk.msra.mxu2 %vm175_vm6, %v1141_v42 }
 0xa4b   :  { %1818 = vmatmul.msk.f32.vlgmr.msra.gmra.mxu2 %vm175_vm6, %v2440_v36 }
 0xa4f   :  { %v1115_v43 = vpop.permute.xlu0 %1114 }
 0xa50   :  { %1815 = vmatpush.xpose.msk.msra.mxu1 %vm175_vm6, %v1115_v43 }
 0xa53   :  { %1816 = vmatmul.msk.f32.vlgmr.msra.gmra.mxu1 %vm175_vm6, %v2444_v38 }
 0xa5f   :  { %v1167_v44 = vpop.permute.xlu1 %1166 }
 0xa60   :  { %1819 = vmatpush.xpose.msk.msra.mxu3 %vm175_vm6, %v1167_v44 }
 0xa63   :  { %1820 = vmatmul.msk.f32.vlgmr.msra.gmra.mxu3 %vm175_vm6, %v2448_v39 }
 0xa67   :  { %v1089_v27 = vpop.permute.xlu1 %1088 }
 0xa68   :  { %1813 = vmatpush.xpose.msk.msrb.mxu0 %vm175_vm6, %v1089_v27 }
 0xa6b   :  { %1814 = vmatmul.msk.f32.vlgmr.msrb.gmra.mxu0 %vm175_vm6, %v2418_v33 }
 0xa7b   :  { %v2478_v45 = vpop.f32.mrf.mxu3 }
 0xa7c   :  { %v1192_v57 = vsel %vm175_vm6, %v2478_v45, -inf }
 0xa84   :  { %v1085_v46 = vpop.f32.mrf.mxu3 }
 0xa85   :  { %v1201_v48 = vsel %vm175_vm6, %v1085_v46, -inf }
 0xa86   :  { %1202 = vmax.xlane.f32.xlu0 %v1201_v48  ;;  %v1033_v49 = vpop.f32.mrf.mxu0 }
 0xa87   :  { %v1195_v50 = vsel %vm175_vm6, %v1033_v49, -inf }
 0xa88   :  { %1196 = vmax.xlane.f32.xlu1 %v1195_v50 }
 0xa9c   :  { %v1059_v51 = vpop.f32.mrf.mxu2 }
 0xa9d   :  { %v1198_v52 = vsel %vm175_vm6, %v1059_v51, -inf }
 0xa9e   :  { %1199 = vmax.xlane.f32.xlu2 %v1198_v52 }
 0xace   :  { %v1163_v53 = vpop.f32.mrf.mxu2 }
 0xacf   :  { %v1210_v54 = vsel %vm175_vm6, %v1163_v53, -inf }
 0xad0   :  { %v1137_v55 = vpop.f32.mrf.mxu1  ;;  %1211 = vmax.xlane.f32.xlu2 %v1210_v54 }
 0xad1   :  { %v1207_v56 = vsel %vm175_vm6, %v1137_v55, -inf }
 0xad2   :  { %1208 = vmax.xlane.f32.xlu1 %v1207_v56 }
 0xad8   :  { %1193 = vmax.xlane.f32.xlu2 %v1192_v57 }
 0xae6   :  { %v1189_v60 = vpop.f32.mrf.mxu3 }
 0xae7   :  { %v1213_v61 = vsel %vm175_vm6, %v1189_v60, -inf }
 0xae8   :  { %v2487_v58 = vpop.f32.mrf.mxu0 }
 0xae9   :  { %v1204_v59 = vsel %vm175_vm6, %v2487_v58, -inf }
 0xaea   :  { %1205 = vmax.xlane.f32.xlu0 %v1204_v59 }
 0xaf2   :  { %1214 = vmax.xlane.f32.xlu0 %v1213_v61 }
 0xaf9   :  { %v1203_v62 = vpop.xlane.xlu0 %1202 }
 0xafa   :  { %v1219_v63 = vsub.f32 %v1085_v46, %v1203_v62 }
 0xafb   :  { %v1197_v15 = vpop.xlane.xlu1 %1196 }
 0xafc   :  { %v1230_v5 = vmul.f32 1.442695, %v1219_v63  ;;  %v1217_v18 = vsub.f32 %v1033_v49, %v1197_v15 }
 0xafe   :  { %1947 = vpow2.f32 %v1230_v5  ;;  %v1226_v19 = vmul.f32 1.442695, %v1217_v18 }
 0xb04   :  { %v1948_v6 = vpop.eup %1947 }
 0xb05   :  { %v1249_v9 = vsel %vm175_vm6, %v1948_v6, 0.0 }
 0xb06   :  { %1250 = vadd.xlane.f32.xlu2 %v1249_v9  ;;  %1880 = vrot.lane.b32.xlu0 %v1879_v8, %s2082_s19 }
 0xb11   :  { %v1200_v11 = vpop.xlane.xlu2 %1199 }
 0xb12   :  { %v1218_v13 = vsub.f32 %v1059_v51, %v1200_v11 }
 0xb14   :  { %v1228_v14 = vmul.f32 1.442695, %v1218_v13 }
 0xb16   :  { %1949 = vpow2.f32 %v1228_v14 }
 0xb17   :  { %1951 = vpow2.f32 %v1226_v19 }
 0xb1c   :  { %v1950_v16 = vpop.eup %1949 }
 0xb1d   :  { %v1246_v17 = vsel %vm175_vm6, %v1950_v16, 0.0  ;;  %v2497_v20 = vpop.eup %1951 }
 0xb1e   :  { %1247 = vadd.xlane.f32.xlu1 %v1246_v17  ;;  %v1243_v1 = vsel %vm175_vm6, %v2497_v20, 0.0 }
 0xb30   :  { %1244 = vadd.xlane.f32.xlu0 %v1243_v1 }
 0xb43   :  { %v1212_v21 = vpop.xlane.xlu2 %1211 }
 0xb44   :  { %1410 = vrot.lane.b32.xlu0 %v2444_v38, %s2082_s19  ;;  %v1222_v7 = vsub.f32 %v1163_v53, %v1212_v21 }
 0xb45   :  { %v1209_v23 = vpop.xlane.xlu1 %1208 }
 0xb46   :  { %v1221_v24 = vsub.f32 %v1137_v55, %v1209_v23  ;;  %v1236_v26 = vmul.f32 1.442695, %v1222_v7 }
 0xb48   :  { %v1234_v12 = vmul.f32 1.442695, %v1221_v24 }
 0xb4a   :  { %1953 = vpow2.f32 %v1234_v12 }
 0xb4b   :  { %1955 = vpow2.f32 %v1236_v26  ;;  %v1194_v30 = vpop.xlane.xlu2 %1193 }
 0xb4c   :  { %v1216_v32 = vsub.f32 %v2478_v45, %v1194_v30  ;;  %v1829_v30 = vld [vmem:[%s2652_s3 + $0x20] sm:$0xff] }
 0xb4e   :  { %v1224_v35 = vmul.f32 1.442695, %v1216_v32 }
 0xb50   :  { %v2503_v28 = vpop.eup %1953  ;;  %1957 = vpow2.f32 %v1224_v35 }
 0xb51   :  { %v1255_v29 = vsel %vm175_vm6, %v2503_v28, 0.0  ;;  %v2507_v22 = vpop.eup %1955 }
 0xb52   :  { %1256 = vadd.xlane.f32.xlu1 %v1255_v29  ;;  %v1258_v0 = vsel %vm175_vm6, %v2507_v22, 0.0  ;;  %v1831_v29 = vld [vmem:[%s2652_s3 + $0x30] sm:$0xff] }
 0xb56   :  { %v1958_v25 = vpop.eup %1957 }
 0xb57   :  { %v1240_v41 = vsel %vm175_vm6, %v1958_v25, 0.0 }
 0xb5a   :  { %1259 = vadd.xlane.f32.xlu1 %v1258_v0 }
 0xb5d   :  { %v1206_v34 = vpop.xlane.xlu0 %1205 }
 0xb65   :  { %v1215_v38 = vpop.xlane.xlu0 %1214 }
 0xb66   :  { %v1223_v47 = vsub.f32 %v1189_v60, %v1215_v38 }
 0xb68   :  { %v1238_v40 = vmul.f32 1.442695, %v1223_v47 }
 0xb6a   :  { %1959 = vpow2.f32 %v1238_v40 }
 0xb6e   :  { %1241 = vadd.xlane.f32.xlu0 %v1240_v41 }
 0xb70   :  { %v1960_v42 = vpop.eup %1959 }
 0xb71   :  { %v1261_v43 = vsel %vm175_vm6, %v1960_v42, 0.0 }
 0xb72   :  { %1262 = vadd.xlane.f32.xlu2 %v1261_v43 }
 0xb73   :  { %1462 = vrot.lane.b32.xlu1 %v2448_v39, %s2082_s19  ;;  %v1884_v39 = vpack.i.bf16 %v2440_v36, %v2436_v4 }
 0xb78   :  { %v1881_v44 = vpop.permute.xlu0 %1880 }
 0xb79   :  { %v1883_v27 = vunpack.i.h.bf16 %v1881_v44  ;;  %v1882_v45 = vunpack.i.l.bf16 %v1881_v44  ;;  %v1251_v46 = vpop.xlane.xlu2 %1250 }
 0xb7a   :  { %1961 = vrcp.f32 %v1251_v46  ;;  %v1523_v46 = vperm.slane %v2403_v3, 3 }
 0xb7b   :  { %1353 = vmatpush.msrb.mxu2 %v1882_v45  ;;  %1379 = vmatpush.msrb.mxu3 %v1883_v27 }
 0xb7c   :  { %1280 = vrot.lane.b32.xlu1 %v2410_v31, %s2082_s19  ;;  %v1220_v31 = vsub.f32 %v2487_v58, %v1206_v34 }
 0xb7e   :  { %v1232_v53 = vmul.f32 1.442695, %v1220_v31 }
 0xb80   :  { %v1962_v48 = vpop.eup %1961 }
 0xb81   :  { %v1275_v49 = vmul.f32 %v1962_v48, %v1948_v6 }
 0xb83   :  { %1824 = vmatmul.msk.f32.vlgmr.msrb.gmra.mxu3 %vm175_vm6, %v1275_v49 }
 0xb84   :  { %1384 = vrot.lane.b32.xlu1 %v2418_v33, %s2082_s19 }
 0xb8a   :  { %1885 = vrot.lane.b32.xlu2 %v1884_v39, %s2082_s19 }
 0xb91   :  { %v1248_v50 = vpop.xlane.xlu1 %1247 }
 0xb92   :  { %1963 = vrcp.f32 %v1248_v50 }
 0xb93   :  { %1965 = vpow2.f32 %v1232_v53 }
 0xb98   :  { %v1964_v51 = vpop.eup %1963 }
 0xb99   :  { %v1274_v52 = vmul.f32 %v1964_v51, %v1950_v16  ;;  %v1966_v54 = vpop.eup %1965 }
 0xb9a   :  { %v1252_v55 = vsel %vm175_vm6, %v1966_v54, 0.0 }
 0xb9b   :  { %1823 = vmatmul.msk.f32.vlgmr.msrb.gmra.mxu2 %vm175_vm6, %v1274_v52 }
 0xba3   :  { %v1245_v33 = vpop.xlane.xlu0 %1244 }
 0xba4   :  { %1967 = vrcp.f32 %v1245_v33 }
 0xbaa   :  { %v1968_v61 = vpop.eup %1967 }
 0xbab   :  { %v1273_v14 = vmul.f32 %v1968_v61, %v2497_v20  ;;  %v1837_v61 = vld [vmem:[%s2653_s4 + $0x30] sm:$0xff] }
 0xbb3   :  { %1253 = vadd.xlane.f32.xlu2 %v1252_v55 }
 0xbb6   :  { %v1411_v57 = vpop.permute.xlu0 %1410 }
 0xbc5   :  { %v1257_v56 = vpop.xlane.xlu1 %1256 }
 0xbcd   :  { %v1260_v4 = vpop.xlane.xlu1 %1259 }
 0xbe1   :  { %v1242_v36 = vpop.xlane.xlu0 %1241 }
 0xbe2   :  { %1969 = vrcp.f32 %v1242_v36 }
 0xbe5   :  { %v1263_v59 = vpop.xlane.xlu2 %1262  ;;  %v1463_v60 = vpop.permute.xlu1 %1462 }
 0xbe6   :  { %1971 = vrcp.f32 %v1263_v59  ;;  %1483 = vmatpush.msra.mxu3 %v1463_v60  ;;  %v1838_v60 = vld [vmem:[%s2653_s4 + $0x38] sm:$0xff] }
 0xbe7   :  { %1973 = vrcp.f32 %v1260_v4 }
 0xbe8   :  { %v1970_v58 = vpop.eup %1969  ;;  %1975 = vrcp.f32 %v1257_v56 }
 0xbe9   :  { %v1272_v8 = vmul.f32 %v1970_v58, %v1958_v25  ;;  %v1836_v58 = vld [vmem:[%s2653_s4 + $0x28] sm:$0xff] }
 0xbec   :  { %v1972_v62 = vpop.eup %1971 }
 0xbed   :  { %v1974_v63 = vpop.eup %1973  ;;  %v1279_v5 = vmul.f32 %v1972_v62, %v1960_v42  ;;  %v1886_v6 = vpop.permute.xlu2 %1885  ;;  %v1835_v62 = vld [vmem:[%s2653_s4 + $0x20] sm:$0xff] }
 0xbee   :  { %v1888_v9 = vunpack.i.h.bf16 %v1886_v6  ;;  %v1887_v11 = vunpack.i.l.bf16 %v1886_v6  ;;  %v1281_v13 = vpop.permute.xlu1 %1280  ;;  %v1278_v15 = vmul.f32 %v1974_v63, %v2507_v22  ;;  %v1976_v16 = vpop.eup %1975  ;;  %v1830_v22 = vld [vmem:[%s2652_s3 + $0x28] sm:$0xff] }
 0xbef   :  { %1301 = vmatpush.msra.mxu0 %v1281_v13  ;;  %1828 = vmatmul.msk.f32.vlgmr.msra.gmra.mxu3 %vm175_vm6, %v1279_v5  ;;  %v1277_v18 = vmul.f32 %v1976_v16, %v2503_v28  ;;  %v1832_v28 = vld [vmem:[%s2652_s3 + $0x38] sm:$0xff]  ;;  %v1847_v16 = vld [vmem:[%s2654_s5 + $0x70] sm:$0xff]  ;;  %s1753_s3 = sshll.u32 %s2655_s6, 4  ;;  %s1754_s3 = int_to_ptr.hbm [resolvable:$true] %s1753_s3 }
 0xbf0   :  { %1821 = vmatmul.msk.f32.vlgmr.msra.gmra.mxu0 %vm175_vm6, %v1272_v8  ;;  %1327 = vmatpush.msrb.mxu1 %v1887_v11 }
 0xbf1   :  { %1457 = vmatpush.msra.mxu2 %v1888_v9  ;;  %1822 = vmatmul.msk.f32.vlgmr.msrb.gmra.mxu1 %vm175_vm6, %v1273_v14 }
 0xbf2   :  { %1431 = vmatpush.msra.mxu1 %v1411_v57  ;;  %1827 = vmatmul.msk.f32.vlgmr.msra.gmra.mxu2 %vm175_vm6, %v1278_v15  ;;  %v1848_v15 = vld [vmem:[%s2654_s5 + $0x78] sm:$0xff] }
 0xbf3   :  { %1672 = vmatpush.msrb.mxu2 %v1848_v15 }
 0xbf4   :  { %1635 = vmatpush.msrb.mxu1 %v1838_v60 }
 0xbf5   :  { %1673 = vmatpush.msrb.mxu2 %v1847_v16 }
 0xbf6   :  { %v1385_v17 = vpop.permute.xlu1 %1384  ;;  %1636 = vmatpush.msrb.mxu1 %v1837_v61 }
 0xbf7   :  { %1405 = vmatpush.msrb.mxu0 %v1385_v17 }
 0xbf8   :  { %1637 = vmatpush.msrb.mxu1 %v1836_v58 }
 0xbf9   :  { %1826 = vmatmul.msk.f32.vlgmr.msra.gmra.mxu1 %vm175_vm6, %v1277_v18  ;;  %1542 = vmatpush.msra.mxu0 %v1832_v28 }
 0xbfa   :  { %1638 = vmatpush.msrb.mxu1 %v1835_v62 }
 0xbfb   :  { %1543 = vmatpush.msra.mxu0 %v1831_v29 }
 0xbfd   :  { %1544 = vmatpush.msra.mxu0 %v1830_v22 }
 0xbff   :  { %1545 = vmatpush.msra.mxu0 %v1829_v30 }
 0xc06   :  { %v1381_v12 = vpop.f32.mrf.mxu3 }
 0xc1e   :  { %v1355_v21 = vpop.f32.mrf.mxu2 }
 0xc26   :  { %v1254_v19 = vpop.xlane.xlu2 %1253 }
 0xc27   :  { %1977 = vrcp.f32 %v1254_v19  ;;  %v1846_v19 = vld [vmem:[%s2654_s5 + $0x68] sm:$0xff] }
 0xc28   :  { %1674 = vmatpush.msrb.mxu2 %v1846_v19 }
 0xc2d   :  { %v1978_v20 = vpop.eup %1977 }
 0xc2e   :  { %v1276_v1 = vmul.f32 %v1978_v20, %v1966_v54 }
 0xc30   :  { %1825 = vmatmul.msk.f32.vlgmr.msrb.gmra.mxu0 %vm175_vm6, %v1276_v1 }
 0xc6d   :  { %v1303_v34 = vpop.f32.mrf.mxu0 }
 0xc6e   :  { %v1329_v23 = vpop.f32.mrf.mxu1 }
 0xc6f   :  { %1490 = vrot.lane.b32.xlu1 %v1329_v23, %s2075_s30 }
 0xc72   :  { %v1485_v26 = vpop.f32.mrf.mxu3 }
 0xc75   :  { %v1459_v24 = vpop.f32.mrf.mxu2 }
 0xc76   :  { %1500 = vrot.lane.b32.xlu0 %v1459_v24, %s2083_s20  ;;  %v1433_v7 = vpop.f32.mrf.mxu1 }
 0xc77   :  { %1498 = vrot.lane.b32.xlu1 %v1355_v21, %s2083_s20  ;;  %1492 = vrot.lane.b32.xlu2 %v1433_v7, %s2075_s30  ;;  %v1845_v21 = vld [vmem:[%s2654_s5 + $0x60] sm:$0xff] }
 0xc78   :  { %1675 = vmatpush.msrb.mxu2 %v1845_v21 }
 0xc7f   :  { %1506 = vrot.lane.b32.xlu1 %v1381_v12, %s2084_s21  ;;  %v1844_v12 = vld [vmem:[%s2654_s5 + $0x58] sm:$0xff] }
 0xc80   :  { %1676 = vmatpush.msrb.mxu2 %v1844_v12 }
 0xc87   :  { %1508 = vrot.lane.b32.xlu1 %v1485_v26, %s2084_s21 }
 0xcad   :  { %v1407_v42 = vpop.f32.mrf.mxu0 }
 0xcd1   :  { %v1493_v25 = vpop.permute.xlu2 %1492 }
 0xcd2   :  { %v1513_v43 = vsel %vm175_vm6, %v1407_v42, %v1493_v25  ;;  %v1608_v42 = vperm.slane %v2403_v3, 5 }
 0xce1   :  { %v1491_v0 = vpop.permute.xlu1 %1490 }
 0xce2   :  { %v1512_v35 = vsel %vm175_vm6, %v1303_v34, %v1491_v0 }
 0xce8   :  { %v1501_v41 = vpop.permute.xlu0 %1500 }
 0xce9   :  { %v1499_v32 = vpop.permute.xlu1 %1498  ;;  %v1515_v44 = vsel %vm704_vm7, %v1513_v43, %v1501_v41 }
 0xcea   :  { %v1514_v38 = vsel %vm704_vm7, %v1512_v35, %v1499_v32 }
 0xcf1   :  { %v1507_v47 = vpop.permute.xlu1 %1506 }
 0xcf2   :  { %v1516_v40 = vsel %vm707_vm8, %v1514_v38, %v1507_v47  ;;  %v1605_v38 = vperm.slane %v2403_v3, 4 }
 0xcf3   :  { %1833 = vmatmul.msk.f32.vlgmr.msra.gmra.mxu0 %vm61_vm0, %v1516_v40 }
 0xcf9   :  { %v1509_v27 = vpop.permute.xlu1 %1508 }
 0xcfa   :  { %v1517_v45 = vsel %vm707_vm8, %v1515_v44, %v1509_v27 }
 0xcfb   :  { %1834 = vmatmul.msk.f32.gmra.mxu0 %vm61_vm0, %v1517_v45 }
 0xd70   :  { %v1547_v48 = vpop.f32.mrf.mxu0 }
 0xd71   :  { %v1548_v49 = vadd.f32 %v1547_v48, %v1523_v46 }
 0xd73   :  { %v2564_v39 = vadd.f32 %v1548_v49, %v2376_v2  ;;  %v1843_v49 = vld [vmem:[%s2654_s5 + $0x50] sm:$0xff] }
 0xd74   :  { %1677 = vmatpush.msrb.mxu2 %v1843_v49 }
 0xd75   :  { %v1555_v50 = vsel %vm61_vm0, %v2564_v39, 0.0 }
 0xd76   :  { %1556 = vadd.xlane.f32.xlu1 %v1555_v50  ;;  %v1842_v50 = vld [vmem:[%s2654_s5 + $0x48] sm:$0xff] }
 0xd77   :  { %1678 = vmatpush.msrb.mxu2 %v1842_v50 }
 0xd78   :  { %v1550_v51 = vpop.f32.mrf.mxu0 }
 0xd79   :  { %v1551_v52 = vadd.f32 %v1550_v51, %v1523_v46  ;;  %v1841_v51 = vld [vmem:[%s2654_s5 + $0x40] sm:$0xff]  ;;  %s2085_s5 = smov [#allocation7]  }
 0xd7a   :  { %1679 = vmatpush.msrb.mxu2 %v1841_v51  ;;  %s1751_s19 = sshll.u32 %s2085_s5, 4  ;;  %s1752_s19 = int_to_ptr.vmem [resolvable:$true] %s1751_s19 }
 0xd7b   :  { %v2569_v31 = vadd.f32 %v1551_v52, %v2381_v37  ;;  %v1616_v52 = vperm.slane %v2403_v3, 6 }
 0xd7d   :  { %v1558_v53 = vsel %vm61_vm0, %v2569_v31, 0.0 }
 0xd7e   :  { %1559 = vadd.xlane.f32.xlu0 %v1558_v53 }
 0xde9   :  { %v1557_v54 = vpop.xlane.xlu1 %1556 }
 0xdea   :  { %v1561_v55 = vmul.f32 %v1557_v54, %v2141_v10 }
 0xdec   :  { %v2575_v33 = vsub.f32 %v2564_v39, %v1561_v55 }
 0xdee   :  { %v1565_v2 = vmul.f32 %v2575_v33, %v2575_v33 }
 0xdf0   :  { %v1567_v56 = vsel %vm61_vm0, %v1565_v2, 0.0 }
 0xdf1   :  { %v1560_v57 = vpop.xlane.xlu0 %1559  ;;  %1568 = vadd.xlane.f32.xlu2 %v1567_v56 }
 0xdf2   :  { %v1562_v37 = vmul.f32 %v1560_v57, %v2141_v10  ;;  %v1657_v57 = vperm.slane %v2403_v3, 7 }
 0xdf4   :  { %v2582_v4 = vsub.f32 %v2569_v31, %v1562_v37 }
 0xdf6   :  { %v1566_v36 = vmul.f32 %v2582_v4, %v2582_v4 }
 0xdf8   :  { %v1570_v59 = vsel %vm61_vm0, %v1566_v36, 0.0 }
 0xdf9   :  { %1571 = vadd.xlane.f32.xlu1 %v1570_v59 }
 0xe64   :  { %v1569_v63 = vpop.xlane.xlu2 %1568 }
 0xe65   :  { %v1573_v5 = vmul.f32 0.032258064, %v1569_v63 }
 0xe67   :  { %1979 = vrsqrt.f32 %v1573_v5  ;;  %vm1582_vm3 = vcmp.eq.f32.partialorder %v1573_v5, inf  ;;  %v1585_v7 = vand.u32 2147483648, %v1573_v5  ;;  %vm1584_vm4 = vcmp.eq.f32.partialorder %v1573_v5, 0.0 }
 0xe6c   :  { %v1572_v6 = vpop.xlane.xlu1 %1571 }
 0xe6d   :  { %v1980_v8 = vpop.eup %1979  ;;  %v1574_v9 = vmul.f32 0.032258064, %v1572_v6 }
 0xe6e   :  { %v1576_v11 = vmul.f32 %v1980_v8, %v1573_v5 }
 0xe6f   :  { %1981 = vrsqrt.f32 %v1574_v9  ;;  %vm1594_vm5 = vcmp.eq.f32.partialorder %v1574_v9, inf  ;;  %v1597_v34 = vand.u32 2147483648, %v1574_v9  ;;  %vm1596_vm6 = vcmp.eq.f32.partialorder %v1574_v9, 0.0 }
 0xe70   :  { %v1577_v13 = vmul.f32 %v1980_v8, %v1576_v11 }
 0xe72   :  { %v1578_v14 = vmul.f32 0.5, %v1577_v13 }
 0xe74   :  { %v1579_v17 = vsub.f32 1.5, %v1578_v14 }
 0xe75   :  { %v1982_v18 = vpop.eup %1981 }
 0xe76   :  { %v1580_v20 = vmul.f32 %v1980_v8, %v1579_v17  ;;  %v1588_v1 = vmul.f32 %v1982_v18, %v1574_v9 }
 0xe78   :  { %v1581_v23 = vmul.f32 %v1580_v20, %v1573_v5  ;;  %v1589_v24 = vmul.f32 %v1982_v18, %v1588_v1 }
 0xe7a   :  { %v1583_v26 = vsel %vm1582_vm3, %v1573_v5, %v1581_v23  ;;  %v1590_v28 = vmul.f32 0.5, %v1589_v24 }
 0xe7b   :  { %v1586_v29 = vsel %vm1584_vm4, %v1585_v7, %v1583_v26 }
 0xe7c   :  { %v1599_v22 = vadd.f32 1e-06, %v1586_v29  ;;  %v1591_v30 = vsub.f32 1.5, %v1590_v28 }
 0xe7e   :  { %1983 = vrcp.f32 %v1599_v22  ;;  %v1592_v0 = vmul.f32 %v1982_v18, %v1591_v30 }
 0xe80   :  { %v1593_v32 = vmul.f32 %v1592_v0, %v1574_v9 }
 0xe82   :  { %v1595_v35 = vsel %vm1594_vm5, %v1574_v9, %v1593_v32 }
 0xe83   :  { %v1598_v47 = vsel %vm1596_vm6, %v1597_v34, %v1595_v35  ;;  %v58_v35 = vld [vmem:[#allocation5 + $0x10] sm:$0x3] }
 0xe84   :  { %v1984_v40 = vpop.eup %1983  ;;  %v1600_v25 = vadd.f32 1e-06, %v1598_v47 }
 0xe85   :  { %v1603_v41 = vmul.f32 %v1984_v40, %v2575_v33 }
 0xe86   :  { %1985 = vrcp.f32 %v1600_v25  ;;  %v1739_v25 = vperm.slane %v58_v35, 0 }
 0xe87   :  { %v1606_v43 = vmul.f32 %v1605_v38, %v1603_v41 }
 0xe89   :  { %v1609_v44 = vadd.f32 %v1608_v42, %v1606_v43 }
 0xe8b   :  { %1839 = vmatmul.msk.f32.vlgmr.msrb.gmra.mxu1 %vm61_vm0, %v1609_v44  ;;  %v1742_v44 = vperm.slane %v58_v35, 1 }
 0xe8c   :  { %v1986_v27 = vpop.eup %1985 }
 0xe8d   :  { %v1604_v45 = vmul.f32 %v1986_v27, %v2582_v4 }
 0xe8f   :  { %v1607_v46 = vmul.f32 %v1605_v38, %v1604_v45 }
 0xe91   :  { %v1610_v48 = vadd.f32 %v1608_v42, %v1607_v46 }
 0xe93   :  { %1840 = vmatmul.msk.f32.gmra.mxu1 %vm61_vm0, %v1610_v48 }
 0xf08   :  { %v1640_v53 = vpop.f32.mrf.mxu1 }
 0xf09   :  { %v1641_v54 = vadd.f32 %v1640_v53, %v1616_v52 }
 0xf0b   :  { %v1646_v55 = vmax.f32 %v1641_v54, 0.0 }
 0xf0d   :  { %1849 = vmatmul.msk.f32.vlgmr.msrb.gmra.mxu2 %vm847_vm13, %v1646_v55 }
 0xf10   :  { %v1643_v33 = vpop.f32.mrf.mxu1 }
 0xf11   :  { %v1644_v2 = vadd.f32 %v1643_v33, %v1616_v52 }
 0xf13   :  { %v1647_v56 = vmax.f32 %v1644_v2, 0.0 }
 0xf15   :  { %1850 = vmatmul.msk.f32.gmra.mxu2 %vm847_vm13, %v1647_v56 }
 0xf90   :  { %v1681_v37 = vpop.f32.mrf.mxu2 }
 0xf91   :  { %v1682_v4 = vadd.f32 %v1681_v37, %v1657_v57 }
 0xf93   :  { %v1687_v36 = vadd.f32 %v1682_v4, %v2564_v39 }
 0xf95   :  { %v1689_v59 = vsel %vm61_vm0, %v1687_v36, 0.0 }
 0xf96   :  { %1690 = vadd.xlane.f32.xlu0 %v1689_v59 }
 0xf98   :  { %v1684_v60 = vpop.f32.mrf.mxu2 }
 0xf99   :  { %v1685_v61 = vadd.f32 %v1684_v60, %v1657_v57 }
 0xf9b   :  { %v1688_v58 = vadd.f32 %v1685_v61, %v2569_v31 }
 0xf9d   :  { %v1692_v62 = vsel %vm61_vm0, %v1688_v58, 0.0 }
 0xf9e   :  { %1693 = vadd.xlane.f32.xlu1 %v1692_v62 }
0x1009   :  { %v1691_v63 = vpop.xlane.xlu0 %1690 }
0x100a   :  { %v1695_v5 = vmul.f32 %v1691_v63, %v2141_v10 }
0x100c   :  { %v1697_v6 = vsub.f32 %v1687_v36, %v1695_v5 }
0x100e   :  { %v1699_v8 = vmul.f32 %v1697_v6, %v1697_v6 }
0x1010   :  { %v1701_v3 = vsel %vm61_vm0, %v1699_v8, 0.0 }
0x1011   :  { %1702 = vadd.xlane.f32.xlu2 %v1701_v3  ;;  %v1694_v9 = vpop.xlane.xlu1 %1693 }
0x1012   :  { %v1696_v39 = vmul.f32 %v1694_v9, %v2141_v10 }
0x1014   :  { %v1698_v11 = vsub.f32 %v1688_v58, %v1696_v39 }
0x1016   :  { %v1700_v13 = vmul.f32 %v1698_v11, %v1698_v11 }
0x1018   :  { %v1704_v14 = vsel %vm61_vm0, %v1700_v13, 0.0 }
0x1019   :  { %1705 = vadd.xlane.f32.xlu0 %v1704_v14 }
0x1084   :  { %v1703_v31 = vpop.xlane.xlu2 %1702 }
0x1085   :  { %v1707_v15 = vmul.f32 0.032258064, %v1703_v31 }
0x1087   :  { %1987 = vrsqrt.f32 %v1707_v15  ;;  %vm1716_vm7 = vcmp.eq.f32.partialorder %v1707_v15, inf  ;;  %v1719_v26 = vand.u32 2147483648, %v1707_v15  ;;  %vm1718_vm8 = vcmp.eq.f32.partialorder %v1707_v15, 0.0 }
0x108c   :  { %v1706_v16 = vpop.xlane.xlu0 %1705 }
0x108d   :  { %v1988_v17 = vpop.eup %1987  ;;  %v1708_v18 = vmul.f32 0.032258064, %v1706_v16 }
0x108e   :  { %v1710_v19 = vmul.f32 %v1988_v17, %v1707_v15 }
0x108f   :  { %1989 = vrsqrt.f32 %v1708_v18  ;;  %vm1728_vm9 = vcmp.eq.f32.partialorder %v1708_v18, inf  ;;  %v1731_v38 = vand.u32 2147483648, %v1708_v18  ;;  %vm1730_vm10 = vcmp.eq.f32.partialorder %v1708_v18, 0.0 }
0x1090   :  { %v1711_v20 = vmul.f32 %v1988_v17, %v1710_v19 }
0x1092   :  { %v1712_v1 = vmul.f32 0.5, %v1711_v20 }
0x1094   :  { %v1713_v21 = vsub.f32 1.5, %v1712_v1 }
0x1095   :  { %v1990_v23 = vpop.eup %1989 }
0x1096   :  { %v1714_v24 = vmul.f32 %v1988_v17, %v1713_v21  ;;  %v1722_v7 = vmul.f32 %v1990_v23, %v1708_v18 }
0x1098   :  { %v1715_v10 = vmul.f32 %v1714_v24, %v1707_v15  ;;  %v1723_v12 = vmul.f32 %v1990_v23, %v1722_v7 }
0x109a   :  { %v1724_v28 = vmul.f32 0.5, %v1723_v12  ;;  %v1717_v29 = vsel %vm1716_vm7, %v1707_v15, %v1715_v10 }
0x109b   :  { %v1720_v22 = vsel %vm1718_vm8, %v1719_v26, %v1717_v29 }
0x109c   :  { %v1725_v30 = vsub.f32 1.5, %v1724_v28  ;;  %v1733_v0 = vadd.f32 1e-06, %v1720_v22 }
0x109e   :  { %v1726_v32 = vmul.f32 %v1990_v23, %v1725_v30  ;;  %1991 = vrcp.f32 %v1733_v0 }
0x10a0   :  { %v1727_v34 = vmul.f32 %v1726_v32, %v1708_v18 }
0x10a2   :  { %v1729_v47 = vsel %vm1728_vm9, %v1708_v18, %v1727_v34 }
0x10a3   :  { %v1732_v40 = vsel %vm1730_vm10, %v1731_v38, %v1729_v47 }
0x10a4   :  { %v1992_v41 = vpop.eup %1991  ;;  %v1734_v42 = vadd.f32 1e-06, %v1732_v40 }
0x10a5   :  { %v1737_v43 = vmul.f32 %v1992_v41, %v1697_v6 }
0x10a6   :  { %1993 = vrcp.f32 %v1734_v42 }
0x10a7   :  { %v1740_v27 = vmul.f32 %v1739_v25, %v1737_v43 }
0x10a9   :  { %v1743_v45 = vadd.f32 %v1742_v44, %v1740_v27 }
0x10ab   :  { %1745 = vst.msk [vmem:[#allocation7] sm:$0xff] %vm61_vm0, %v1743_v45 }
0x10ac   :  { %v1994_v46 = vpop.eup %1993 }
0x10ad   :  { %v1738_v48 = vmul.f32 %v1994_v46, %v1698_v11 }
0x10af   :  { %v1741_v49 = vmul.f32 %v1739_v25, %v1738_v48 }
0x10b1   :  { %v1744_v50 = vadd.f32 %v1742_v44, %v1741_v49 }
0x10b3   :  { %1746 = vst.msk [vmem:[#allocation7 + $0x8] sm:$0xff] %vm61_vm0, %v1744_v50 }
0x10b4   :  { %1759 = dma.vmem_to_hbm [thread:$0]  %s1752_s19, 256, %s1754_s3, [#allocation4], %s2074_s29, %s2074_s29, %s2075_s30  }
0x10b5   :  { %2071 = dma.done.wait [#allocation4], 256  }
0x10b6   :  { %2072 = vsyncadd [#allocation4], 4294967040 }
0x10b7   :  { %1764 = vsyncpa [#allocation3], 1 }
0x10b8   :  { %1765 = vsyncpa [#allocation6], 1 }
0x10b9   :  { %1766 = vsyncpa [#allocation4], 1 }

</bundles_post_ra>
